<compile_context>
chip_gen: v7x
topology: tpu7x:2x2x1
jax: 0.10.0
libtpu: 0.0.40
codegen_flags: <defaults>
</compile_context>

<pallas_src>
import functools

import numpy as np

import jax
import jax.numpy as jnp
from jax.experimental import pallas as pl
from jax.experimental.pallas import tpu as pltpu


def gaussian_taps_1d(ksize, std):
    """Matches GaussianBlur.gaussian_kernel_1d; returns Python floats."""
    x = np.arange(ksize, dtype=np.float64) + (0.5 - ksize * 0.5)
    k = np.exp(-0.5 * x * x / (std * std))
    k = k / k.sum()
    return tuple(float(v) for v in k)


def _edge_indices(n, pad):
    """Output indices along an axis whose taps hit the replicated border."""
    return [i for i in range(n) if i < pad or i >= n - pad]


def _clamped_taps(i, n, taps, pad):
    """Fold taps whose (clamped) source index coincides: replication pad."""
    folded = {}
    for u, t in enumerate(taps):
        src = min(max(i + u - pad, 0), n - 1)
        folded[src] = folded.get(src, 0.0) + t
    return sorted(folded.items())


def _blur_kernel(x_ref, o_ref, acc_ref, *, taps, pad, h, w):
    """Fused separable Gaussian blur with in-kernel replication padding.

    x_ref  : (rb, H, W) unpadded input block in VMEM.
    o_ref  : (rb, H, W) output block in VMEM.
    acc_ref: (rb, H, W) f32 VMEM scratch holding the vertical-pass result.
    """
    ksize = len(taps)
    f32 = jnp.float32

    # ---------------- Vertical (H) pass ----------------
    # Interior rows: plain valid convolution, every source slice in bounds.
    hi = h - 2 * pad
    if hi > 0:
        acc = taps[0] * x_ref[:, 0:hi, :].astype(f32)
        for u in range(1, ksize):
            acc = acc + taps[u] * x_ref[:, u:u + hi, :].astype(f32)
        acc_ref[:, pad:pad + hi, :] = acc
    # Border rows: replication pad folded into per-row weights.
    for i in _edge_indices(h, pad):
        row = None
        for src, wt in _clamped_taps(i, h, taps, pad):
            term = wt * x_ref[:, src:src + 1, :].astype(f32)
            row = term if row is None else row + term
        acc_ref[:, i:i + 1, :] = row

    # ---------------- Horizontal (W) pass ----------------
    # (Padding W after the vertical pass is exact: the vertical conv acts per
    #  column, so it commutes with edge-replication along W.)
    wi = w - 2 * pad
    if wi > 0:
        out = taps[0] * acc_ref[:, :, 0:wi]
        for v in range(1, ksize):
            out = out + taps[v] * acc_ref[:, :, v:v + wi]
        o_ref[:, :, pad:pad + wi] = out.astype(o_ref.dtype)
    for j in _edge_indices(w, pad):
        col = None
        for src, wt in _clamped_taps(j, w, taps, pad):
            term = wt * acc_ref[:, :, src:src + 1]
            col = term if col is None else col + term
        o_ref[:, :, j:j + 1] = col.astype(o_ref.dtype)


def _vmem_capacity_bytes():
    try:
        return int(pltpu.get_tpu_info().vmem_capacity_bytes)
    except Exception:
        return 64 * 1024 * 1024  # conservative: v7x physical VMEM per core


def gaussian_blur(x, *, ksize=5, std=1.0):
    """x: (B, C, H, W) float32 NCHW.  Returns the blurred tensor, same shape."""
    B, C, H, W = x.shape
    pad = ksize // 2
    taps = gaussian_taps_1d(ksize, std)
    R = B * C
    x2 = x.reshape(R, H, W)

    # ---- per-generation VMEM budget ----
    # Per batch*channel row: input block (double-buffered) + output block
    # (double-buffered) + acc scratch + ~2 live values, with the last two dims
    # rounded up to the (8,128) layout tile.
    hs = -(-H // 8) * 8
    ws = -(-W // 128) * 128
    bytes_per_row = 7 * hs * ws * 4
    vmem_cap = _vmem_capacity_bytes()              # 128 MiB v5e/v6e, 64 MiB v7x
    vmem_limit = min(vmem_cap * 3 // 4, 96 * 1024 * 1024)
    budget = vmem_limit * 2 // 3                    # working-set target w/ headroom
    rb = max(1, min(R, budget // bytes_per_row))
    if R >= 2:
        rb = min(rb, (R + 1) // 2)  # >=2 grid steps -> both v7x TensorCores busy
    grid = (pl.cdiv(R, rb),)
    # TODO(synk): images so large that one (H,W) slice blows the budget would
    # additionally need H tiling; not required for this module's use.

    kernel = functools.partial(_blur_kernel, taps=taps, pad=pad, h=H, w=W)
    out = pl.pallas_call(
        kernel,
        out_shape=jax.ShapeDtypeStruct((R, H, W), x.dtype),
        grid=grid,
        in_specs=[pl.BlockSpec((rb, H, W), lambda i: (i, 0, 0))],
        out_specs=pl.BlockSpec((rb, H, W), lambda i: (i, 0, 0)),
        scratch_shapes=[pltpu.VMEM((rb, H, W), jnp.float32)],
        compiler_params=pltpu.CompilerParams(
            dimension_semantics=("parallel",),
            vmem_limit_bytes=vmem_limit),
    )(x2)
    return out.reshape(B, C, H, W)


def gaussian_blur_ref(x, taps, *, ksize):
    """Pure-JAX reference: ReplicationPad2d + separable cross-correlation."""
    B, C, H, W = x.shape
    pad = ksize // 2
    k = jnp.asarray(taps, jnp.float32)
    xp = jnp.pad(x, ((0, 0), (0, 0), (pad, pad), (pad, pad)), mode="edge")
    acc = sum(k[u] * xp[:, :, u:u + H, :] for u in range(ksize))
    out = sum(k[v] * acc[:, :, :, v:v + W] for v in range(ksize))
    return out


if __name__ == "__main__":
    KSIZE, STD = 5, 1.0
    key = jax.random.PRNGKey(0)
    # GaussianBlur.forward expects 3 input channels (kernel repeated 3x,
    # applied depthwise with groups=num_ch).
    x = jax.random.normal(key, (2, 3, 16, 16), jnp.float32)

    fn = jax.jit(functools.partial(gaussian_blur, ksize=KSIZE, std=STD))
    y = fn(x)
    jax.block_until_ready(y)

    assert y.shape == x.shape, y.shape
    assert bool(jnp.all(jnp.isfinite(y)))
    y_ref = gaussian_blur_ref(x, gaussian_taps_1d(KSIZE, STD), ksize=KSIZE)
    max_err = float(jnp.max(jnp.abs(y - y_ref)))
    assert max_err < 1e-5, max_err
    print("KERNEL_OK")
</pallas_src>

<mosaic_0001>
module attributes {stable_mosaic.version = 11 : i64} {
  func.func @_blur_kernel(%arg0: i32, %arg1: memref<3x16x16xf32, #tpu.memory_space<vmem>>, %arg2: memref<3x16x16xf32, #tpu.memory_space<vmem>>, %arg3: memref<3x16x16xf32, #tpu.memory_space<vmem>>) attributes {dimension_semantics = [#tpu.dimension_semantics<parallel>], iteration_bounds = array<i64: 2>, scalar_prefetch = 0 : i64, scratch_operands = 1 : i64, tpu.core_type = #tpu.core_type<tc>, window_params = [{transform_indices = @transform_0, window_bounds = array<i64: 3, 16, 16>}, {transform_indices = @transform_1, window_bounds = array<i64: 3, 16, 16>}]} {
    %c0 = arith.constant 0 : index
    %c0_0 = arith.constant 0 : index
    %c0_1 = arith.constant 0 : index
    %0 = vector.load %arg1[%c0, %c0_0, %c0_1] : memref<3x16x16xf32, #tpu.memory_space<vmem>>, vector<3x12x16xf32>
    %cst = arith.constant 0.054488685 : f32
    %1 = vector.broadcast %cst : f32 to vector<3x12x16xf32>
    %2 = arith.mulf %1, %0 : vector<3x12x16xf32>
    %c0_2 = arith.constant 0 : index
    %c1 = arith.constant 1 : index
    %c0_3 = arith.constant 0 : index
    %3 = vector.load %arg1[%c0_2, %c1, %c0_3] : memref<3x16x16xf32, #tpu.memory_space<vmem>>, vector<3x12x16xf32>
    %cst_4 = arith.constant 0.244201347 : f32
    %4 = vector.broadcast %cst_4 : f32 to vector<3x12x16xf32>
    %5 = arith.mulf %4, %3 : vector<3x12x16xf32>
    %6 = arith.addf %2, %5 : vector<3x12x16xf32>
    %c0_5 = arith.constant 0 : index
    %c2 = arith.constant 2 : index
    %c0_6 = arith.constant 0 : index
    %7 = vector.load %arg1[%c0_5, %c2, %c0_6] : memref<3x16x16xf32, #tpu.memory_space<vmem>>, vector<3x12x16xf32>
    %cst_7 = arith.constant 0.402619958 : f32
    %8 = vector.broadcast %cst_7 : f32 to vector<3x12x16xf32>
    %9 = arith.mulf %8, %7 : vector<3x12x16xf32>
    %10 = arith.addf %6, %9 : vector<3x12x16xf32>
    %c0_8 = arith.constant 0 : index
    %c3 = arith.constant 3 : index
    %c0_9 = arith.constant 0 : index
    %11 = vector.load %arg1[%c0_8, %c3, %c0_9] : memref<3x16x16xf32, #tpu.memory_space<vmem>>, vector<3x12x16xf32>
    %cst_10 = arith.constant 0.244201347 : f32
    %12 = vector.broadcast %cst_10 : f32 to vector<3x12x16xf32>
    %13 = arith.mulf %12, %11 : vector<3x12x16xf32>
    %14 = arith.addf %10, %13 : vector<3x12x16xf32>
    %c0_11 = arith.constant 0 : index
    %c4 = arith.constant 4 : index
    %c0_12 = arith.constant 0 : index
    %15 = vector.load %arg1[%c0_11, %c4, %c0_12] : memref<3x16x16xf32, #tpu.memory_space<vmem>>, vector<3x12x16xf32>
    %cst_13 = arith.constant 0.054488685 : f32
    %16 = vector.broadcast %cst_13 : f32 to vector<3x12x16xf32>
    %17 = arith.mulf %16, %15 : vector<3x12x16xf32>
    %18 = arith.addf %14, %17 : vector<3x12x16xf32>
    %c0_14 = arith.constant 0 : index
    %c2_15 = arith.constant 2 : index
    %c0_16 = arith.constant 0 : index
    %19 = vector.load %arg3[%c0_14, %c2_15, %c0_16] : memref<3x16x16xf32, #tpu.memory_space<vmem>>, vector<3x12x16xf32>
    tpu.vector_store %arg3[%c0_14, %c2_15, %c0_16], %18 {strides = array<i32>} : memref<3x16x16xf32, #tpu.memory_space<vmem>>, vector<3x12x16xf32>,
    %c0_17 = arith.constant 0 : index
    %c0_18 = arith.constant 0 : index
    %c0_19 = arith.constant 0 : index
    %20 = vector.load %arg1[%c0_17, %c0_18, %c0_19] : memref<3x16x16xf32, #tpu.memory_space<vmem>>, vector<3x1x16xf32>
    %cst_20 = arith.constant 0.701309978 : f32
    %21 = vector.broadcast %cst_20 : f32 to vector<3x1x16xf32>
    %22 = arith.mulf %21, %20 : vector<3x1x16xf32>
    %c0_21 = arith.constant 0 : index
    %c1_22 = arith.constant 1 : index
    %c0_23 = arith.constant 0 : index
    %23 = vector.load %arg1[%c0_21, %c1_22, %c0_23] : memref<3x16x16xf32, #tpu.memory_space<vmem>>, vector<3x1x16xf32>
    %cst_24 = arith.constant 0.244201347 : f32
    %24 = vector.broadcast %cst_24 : f32 to vector<3x1x16xf32>
    %25 = arith.mulf %24, %23 : vector<3x1x16xf32>
    %26 = arith.addf %22, %25 : vector<3x1x16xf32>
    %c0_25 = arith.constant 0 : index
    %c2_26 = arith.constant 2 : index
    %c0_27 = arith.constant 0 : index
    %27 = vector.load %arg1[%c0_25, %c2_26, %c0_27] : memref<3x16x16xf32, #tpu.memory_space<vmem>>, vector<3x1x16xf32>
    %cst_28 = arith.constant 0.054488685 : f32
    %28 = vector.broadcast %cst_28 : f32 to vector<3x1x16xf32>
    %29 = arith.mulf %28, %27 : vector<3x1x16xf32>
    %30 = arith.addf %26, %29 : vector<3x1x16xf32>
    %c0_29 = arith.constant 0 : index
    %c0_30 = arith.constant 0 : index
    %c0_31 = arith.constant 0 : index
    %31 = vector.load %arg3[%c0_29, %c0_30, %c0_31] : memref<3x16x16xf32, #tpu.memory_space<vmem>>, vector<3x1x16xf32>
    tpu.vector_store %arg3[%c0_29, %c0_30, %c0_31], %30 {strides = array<i32>} : memref<3x16x16xf32, #tpu.memory_space<vmem>>, vector<3x1x16xf32>,
    %c0_32 = arith.constant 0 : index
    %c0_33 = arith.constant 0 : index
    %c0_34 = arith.constant 0 : index
    %32 = vector.load %arg1[%c0_32, %c0_33, %c0_34] : memref<3x16x16xf32, #tpu.memory_space<vmem>>, vector<3x1x16xf32>
    %cst_35 = arith.constant 0.298690021 : f32
    %33 = vector.broadcast %cst_35 : f32 to vector<3x1x16xf32>
    %34 = arith.mulf %33, %32 : vector<3x1x16xf32>
    %c0_36 = arith.constant 0 : index
    %c1_37 = arith.constant 1 : index
    %c0_38 = arith.constant 0 : index
    %35 = vector.load %arg1[%c0_36, %c1_37, %c0_38] : memref<3x16x16xf32, #tpu.memory_space<vmem>>, vector<3x1x16xf32>
    %cst_39 = arith.constant 0.402619958 : f32
    %36 = vector.broadcast %cst_39 : f32 to vector<3x1x16xf32>
    %37 = arith.mulf %36, %35 : vector<3x1x16xf32>
    %38 = arith.addf %34, %37 : vector<3x1x16xf32>
    %c0_40 = arith.constant 0 : index
    %c2_41 = arith.constant 2 : index
    %c0_42 = arith.constant 0 : index
    %39 = vector.load %arg1[%c0_40, %c2_41, %c0_42] : memref<3x16x16xf32, #tpu.memory_space<vmem>>, vector<3x1x16xf32>
    %cst_43 = arith.constant 0.244201347 : f32
    %40 = vector.broadcast %cst_43 : f32 to vector<3x1x16xf32>
    %41 = arith.mulf %40, %39 : vector<3x1x16xf32>
    %42 = arith.addf %38, %41 : vector<3x1x16xf32>
    %c0_44 = arith.constant 0 : index
    %c3_45 = arith.constant 3 : index
    %c0_46 = arith.constant 0 : index
    %43 = vector.load %arg1[%c0_44, %c3_45, %c0_46] : memref<3x16x16xf32, #tpu.memory_space<vmem>>, vector<3x1x16xf32>
    %cst_47 = arith.constant 0.054488685 : f32
    %44 = vector.broadcast %cst_47 : f32 to vector<3x1x16xf32>
    %45 = arith.mulf %44, %43 : vector<3x1x16xf32>
    %46 = arith.addf %42, %45 : vector<3x1x16xf32>
    %c0_48 = arith.constant 0 : index
    %c1_49 = arith.constant 1 : index
    %c0_50 = arith.constant 0 : index
    %47 = vector.load %arg3[%c0_48, %c1_49, %c0_50] : memref<3x16x16xf32, #tpu.memory_space<vmem>>, vector<3x1x16xf32>
    tpu.vector_store %arg3[%c0_48, %c1_49, %c0_50], %46 {strides = array<i32>} : memref<3x16x16xf32, #tpu.memory_space<vmem>>, vector<3x1x16xf32>,
    %c0_51 = arith.constant 0 : index
    %c12 = arith.constant 12 : index
    %c0_52 = arith.constant 0 : index
    %48 = vector.load %arg1[%c0_51, %c12, %c0_52] : memref<3x16x16xf32, #tpu.memory_space<vmem>>, vector<3x1x16xf32>
    %cst_53 = arith.constant 0.054488685 : f32
    %49 = vector.broadcast %cst_53 : f32 to vector<3x1x16xf32>
    %50 = arith.mulf %49, %48 : vector<3x1x16xf32>
    %c0_54 = arith.constant 0 : index
    %c13 = arith.constant 13 : index
    %c0_55 = arith.constant 0 : index
    %51 = vector.load %arg1[%c0_54, %c13, %c0_55] : memref<3x16x16xf32, #tpu.memory_space<vmem>>, vector<3x1x16xf32>
    %cst_56 = arith.constant 0.244201347 : f32
    %52 = vector.broadcast %cst_56 : f32 to vector<3x1x16xf32>
    %53 = arith.mulf %52, %51 : vector<3x1x16xf32>
    %54 = arith.addf %50, %53 : vector<3x1x16xf32>
    %c0_57 = arith.constant 0 : index
    %c14 = arith.constant 14 : index
    %c0_58 = arith.constant 0 : index
    %55 = vector.load %arg1[%c0_57, %c14, %c0_58] : memref<3x16x16xf32, #tpu.memory_space<vmem>>, vector<3x1x16xf32>
    %cst_59 = arith.constant 0.402619958 : f32
    %56 = vector.broadcast %cst_59 : f32 to vector<3x1x16xf32>
    %57 = arith.mulf %56, %55 : vector<3x1x16xf32>
    %58 = arith.addf %54, %57 : vector<3x1x16xf32>
    %c0_60 = arith.constant 0 : index
    %c15 = arith.constant 15 : index
    %c0_61 = arith.constant 0 : index
    %59 = vector.load %arg1[%c0_60, %c15, %c0_61] : memref<3x16x16xf32, #tpu.memory_space<vmem>>, vector<3x1x16xf32>
    %cst_62 = arith.constant 0.298690021 : f32
    %60 = vector.broadcast %cst_62 : f32 to vector<3x1x16xf32>
    %61 = arith.mulf %60, %59 : vector<3x1x16xf32>
    %62 = arith.addf %58, %61 : vector<3x1x16xf32>
    %c0_63 = arith.constant 0 : index
    %c14_64 = arith.constant 14 : index
    %c0_65 = arith.constant 0 : index
    %63 = vector.load %arg3[%c0_63, %c14_64, %c0_65] : memref<3x16x16xf32, #tpu.memory_space<vmem>>, vector<3x1x16xf32>
    tpu.vector_store %arg3[%c0_63, %c14_64, %c0_65], %62 {strides = array<i32>} : memref<3x16x16xf32, #tpu.memory_space<vmem>>, vector<3x1x16xf32>,
    %c0_66 = arith.constant 0 : index
    %c13_67 = arith.constant 13 : index
    %c0_68 = arith.constant 0 : index
    %64 = vector.load %arg1[%c0_66, %c13_67, %c0_68] : memref<3x16x16xf32, #tpu.memory_space<vmem>>, vector<3x1x16xf32>
    %cst_69 = arith.constant 0.054488685 : f32
    %65 = vector.broadcast %cst_69 : f32 to vector<3x1x16xf32>
    %66 = arith.mulf %65, %64 : vector<3x1x16xf32>
    %c0_70 = arith.constant 0 : index
    %c14_71 = arith.constant 14 : index
    %c0_72 = arith.constant 0 : index
    %67 = vector.load %arg1[%c0_70, %c14_71, %c0_72] : memref<3x16x16xf32, #tpu.memory_space<vmem>>, vector<3x1x16xf32>
    %cst_73 = arith.constant 0.244201347 : f32
    %68 = vector.broadcast %cst_73 : f32 to vector<3x1x16xf32>
    %69 = arith.mulf %68, %67 : vector<3x1x16xf32>
    %70 = arith.addf %66, %69 : vector<3x1x16xf32>
    %c0_74 = arith.constant 0 : index
    %c15_75 = arith.constant 15 : index
    %c0_76 = arith.constant 0 : index
    %71 = vector.load %arg1[%c0_74, %c15_75, %c0_76] : memref<3x16x16xf32, #tpu.memory_space<vmem>>, vector<3x1x16xf32>
    %cst_77 = arith.constant 0.701309978 : f32
    %72 = vector.broadcast %cst_77 : f32 to vector<3x1x16xf32>
    %73 = arith.mulf %72, %71 : vector<3x1x16xf32>
    %74 = arith.addf %70, %73 : vector<3x1x16xf32>
    %c0_78 = arith.constant 0 : index
    %c15_79 = arith.constant 15 : index
    %c0_80 = arith.constant 0 : index
    %75 = vector.load %arg3[%c0_78, %c15_79, %c0_80] : memref<3x16x16xf32, #tpu.memory_space<vmem>>, vector<3x1x16xf32>
    tpu.vector_store %arg3[%c0_78, %c15_79, %c0_80], %74 {strides = array<i32>} : memref<3x16x16xf32, #tpu.memory_space<vmem>>, vector<3x1x16xf32>,
    %c0_81 = arith.constant 0 : index
    %c0_82 = arith.constant 0 : index
    %c0_83 = arith.constant 0 : index
    %76 = vector.load %arg3[%c0_81, %c0_82, %c0_83] : memref<3x16x16xf32, #tpu.memory_space<vmem>>, vector<3x16x12xf32>
    %cst_84 = arith.constant 0.054488685 : f32
    %77 = vector.broadcast %cst_84 : f32 to vector<3x16x12xf32>
    %78 = arith.mulf %77, %76 : vector<3x16x12xf32>
    %c0_85 = arith.constant 0 : index
    %c0_86 = arith.constant 0 : index
    %c1_87 = arith.constant 1 : index
    %79 = vector.load %arg3[%c0_85, %c0_86, %c1_87] : memref<3x16x16xf32, #tpu.memory_space<vmem>>, vector<3x16x12xf32>
    %cst_88 = arith.constant 0.244201347 : f32
    %80 = vector.broadcast %cst_88 : f32 to vector<3x16x12xf32>
    %81 = arith.mulf %80, %79 : vector<3x16x12xf32>
    %82 = arith.addf %78, %81 : vector<3x16x12xf32>
    %c0_89 = arith.constant 0 : index
    %c0_90 = arith.constant 0 : index
    %c2_91 = arith.constant 2 : index
    %83 = vector.load %arg3[%c0_89, %c0_90, %c2_91] : memref<3x16x16xf32, #tpu.memory_space<vmem>>, vector<3x16x12xf32>
    %cst_92 = arith.constant 0.402619958 : f32
    %84 = vector.broadcast %cst_92 : f32 to vector<3x16x12xf32>
    %85 = arith.mulf %84, %83 : vector<3x16x12xf32>
    %86 = arith.addf %82, %85 : vector<3x16x12xf32>
    %c0_93 = arith.constant 0 : index
    %c0_94 = arith.constant 0 : index
    %c3_95 = arith.constant 3 : index
    %87 = vector.load %arg3[%c0_93, %c0_94, %c3_95] : memref<3x16x16xf32, #tpu.memory_space<vmem>>, vector<3x16x12xf32>
    %cst_96 = arith.constant 0.244201347 : f32
    %88 = vector.broadcast %cst_96 : f32 to vector<3x16x12xf32>
    %89 = arith.mulf %88, %87 : vector<3x16x12xf32>
    %90 = arith.addf %86, %89 : vector<3x16x12xf32>
    %c0_97 = arith.constant 0 : index
    %c0_98 = arith.constant 0 : index
    %c4_99 = arith.constant 4 : index
    %91 = vector.load %arg3[%c0_97, %c0_98, %c4_99] : memref<3x16x16xf32, #tpu.memory_space<vmem>>, vector<3x16x12xf32>
    %cst_100 = arith.constant 0.054488685 : f32
    %92 = vector.broadcast %cst_100 : f32 to vector<3x16x12xf32>
    %93 = arith.mulf %92, %91 : vector<3x16x12xf32>
    %94 = arith.addf %90, %93 : vector<3x16x12xf32>
    %c0_101 = arith.constant 0 : index
    %c0_102 = arith.constant 0 : index
    %c2_103 = arith.constant 2 : index
    %95 = vector.load %arg2[%c0_101, %c0_102, %c2_103] : memref<3x16x16xf32, #tpu.memory_space<vmem>>, vector<3x16x12xf32>
    tpu.vector_store %arg2[%c0_101, %c0_102, %c2_103], %94 {strides = array<i32>} : memref<3x16x16xf32, #tpu.memory_space<vmem>>, vector<3x16x12xf32>,
    %c0_104 = arith.constant 0 : index
    %c0_105 = arith.constant 0 : index
    %c0_106 = arith.constant 0 : index
    %96 = vector.load %arg3[%c0_104, %c0_105, %c0_106] : memref<3x16x16xf32, #tpu.memory_space<vmem>>, vector<3x16x1xf32>
    %cst_107 = arith.constant 0.701309978 : f32
    %97 = vector.broadcast %cst_107 : f32 to vector<3x16x1xf32>
    %98 = arith.mulf %97, %96 : vector<3x16x1xf32>
    %c0_108 = arith.constant 0 : index
    %c0_109 = arith.constant 0 : index
    %c1_110 = arith.constant 1 : index
    %99 = vector.load %arg3[%c0_108, %c0_109, %c1_110] : memref<3x16x16xf32, #tpu.memory_space<vmem>>, vector<3x16x1xf32>
    %cst_111 = arith.constant 0.244201347 : f32
    %100 = vector.broadcast %cst_111 : f32 to vector<3x16x1xf32>
    %101 = arith.mulf %100, %99 : vector<3x16x1xf32>
    %102 = arith.addf %98, %101 : vector<3x16x1xf32>
    %c0_112 = arith.constant 0 : index
    %c0_113 = arith.constant 0 : index
    %c2_114 = arith.constant 2 : index
    %103 = vector.load %arg3[%c0_112, %c0_113, %c2_114] : memref<3x16x16xf32, #tpu.memory_space<vmem>>, vector<3x16x1xf32>
    %cst_115 = arith.constant 0.054488685 : f32
    %104 = vector.broadcast %cst_115 : f32 to vector<3x16x1xf32>
    %105 = arith.mulf %104, %103 : vector<3x16x1xf32>
    %106 = arith.addf %102, %105 : vector<3x16x1xf32>
    %c0_116 = arith.constant 0 : index
    %c0_117 = arith.constant 0 : index
    %c0_118 = arith.constant 0 : index
    %107 = vector.load %arg2[%c0_116, %c0_117, %c0_118] : memref<3x16x16xf32, #tpu.memory_space<vmem>>, vector<3x16x1xf32>
    tpu.vector_store %arg2[%c0_116, %c0_117, %c0_118], %106 {strides = array<i32>} : memref<3x16x16xf32, #tpu.memory_space<vmem>>, vector<3x16x1xf32>,
    %c0_119 = arith.constant 0 : index
    %c0_120 = arith.constant 0 : index
    %c0_121 = arith.constant 0 : index
    %108 = vector.load %arg3[%c0_119, %c0_120, %c0_121] : memref<3x16x16xf32, #tpu.memory_space<vmem>>, vector<3x16x1xf32>
    %cst_122 = arith.constant 0.298690021 : f32
    %109 = vector.broadcast %cst_122 : f32 to vector<3x16x1xf32>
    %110 = arith.mulf %109, %108 : vector<3x16x1xf32>
    %c0_123 = arith.constant 0 : index
    %c0_124 = arith.constant 0 : index
    %c1_125 = arith.constant 1 : index
    %111 = vector.load %arg3[%c0_123, %c0_124, %c1_125] : memref<3x16x16xf32, #tpu.memory_space<vmem>>, vector<3x16x1xf32>
    %cst_126 = arith.constant 0.402619958 : f32
    %112 = vector.broadcast %cst_126 : f32 to vector<3x16x1xf32>
    %113 = arith.mulf %112, %111 : vector<3x16x1xf32>
    %114 = arith.addf %110, %113 : vector<3x16x1xf32>
    %c0_127 = arith.constant 0 : index
    %c0_128 = arith.constant 0 : index
    %c2_129 = arith.constant 2 : index
    %115 = vector.load %arg3[%c0_127, %c0_128, %c2_129] : memref<3x16x16xf32, #tpu.memory_space<vmem>>, vector<3x16x1xf32>
    %cst_130 = arith.constant 0.244201347 : f32
    %116 = vector.broadcast %cst_130 : f32 to vector<3x16x1xf32>
    %117 = arith.mulf %116, %115 : vector<3x16x1xf32>
    %118 = arith.addf %114, %117 : vector<3x16x1xf32>
    %c0_131 = arith.constant 0 : index
    %c0_132 = arith.constant 0 : index
    %c3_133 = arith.constant 3 : index
    %119 = vector.load %arg3[%c0_131, %c0_132, %c3_133] : memref<3x16x16xf32, #tpu.memory_space<vmem>>, vector<3x16x1xf32>
    %cst_134 = arith.constant 0.054488685 : f32
    %120 = vector.broadcast %cst_134 : f32 to vector<3x16x1xf32>
    %121 = arith.mulf %120, %119 : vector<3x16x1xf32>
    %122 = arith.addf %118, %121 : vector<3x16x1xf32>
    %c0_135 = arith.constant 0 : index
    %c0_136 = arith.constant 0 : index
    %c1_137 = arith.constant 1 : index
    %123 = vector.load %arg2[%c0_135, %c0_136, %c1_137] : memref<3x16x16xf32, #tpu.memory_space<vmem>>, vector<3x16x1xf32>
    tpu.vector_store %arg2[%c0_135, %c0_136, %c1_137], %122 {strides = array<i32>} : memref<3x16x16xf32, #tpu.memory_space<vmem>>, vector<3x16x1xf32>,
    %c0_138 = arith.constant 0 : index
    %c0_139 = arith.constant 0 : index
    %c12_140 = arith.constant 12 : index
    %124 = vector.load %arg3[%c0_138, %c0_139, %c12_140] : memref<3x16x16xf32, #tpu.memory_space<vmem>>, vector<3x16x1xf32>
    %cst_141 = arith.constant 0.054488685 : f32
    %125 = vector.broadcast %cst_141 : f32 to vector<3x16x1xf32>
    %126 = arith.mulf %125, %124 : vector<3x16x1xf32>
    %c0_142 = arith.constant 0 : index
    %c0_143 = arith.constant 0 : index
    %c13_144 = arith.constant 13 : index
    %127 = vector.load %arg3[%c0_142, %c0_143, %c13_144] : memref<3x16x16xf32, #tpu.memory_space<vmem>>, vector<3x16x1xf32>
    %cst_145 = arith.constant 0.244201347 : f32
    %128 = vector.broadcast %cst_145 : f32 to vector<3x16x1xf32>
    %129 = arith.mulf %128, %127 : vector<3x16x1xf32>
    %130 = arith.addf %126, %129 : vector<3x16x1xf32>
    %c0_146 = arith.constant 0 : index
    %c0_147 = arith.constant 0 : index
    %c14_148 = arith.constant 14 : index
    %131 = vector.load %arg3[%c0_146, %c0_147, %c14_148] : memref<3x16x16xf32, #tpu.memory_space<vmem>>, vector<3x16x1xf32>
    %cst_149 = arith.constant 0.402619958 : f32
    %132 = vector.broadcast %cst_149 : f32 to vector<3x16x1xf32>
    %133 = arith.mulf %132, %131 : vector<3x16x1xf32>
    %134 = arith.addf %130, %133 : vector<3x16x1xf32>
    %c0_150 = arith.constant 0 : index
    %c0_151 = arith.constant 0 : index
    %c15_152 = arith.constant 15 : index
    %135 = vector.load %arg3[%c0_150, %c0_151, %c15_152] : memref<3x16x16xf32, #tpu.memory_space<vmem>>, vector<3x16x1xf32>
    %cst_153 = arith.constant 0.298690021 : f32
    %136 = vector.broadcast %cst_153 : f32 to vector<3x16x1xf32>
    %137 = arith.mulf %136, %135 : vector<3x16x1xf32>
    %138 = arith.addf %134, %137 : vector<3x16x1xf32>
    %c0_154 = arith.constant 0 : index
    %c0_155 = arith.constant 0 : index
    %c14_156 = arith.constant 14 : index
    %139 = vector.load %arg2[%c0_154, %c0_155, %c14_156] : memref<3x16x16xf32, #tpu.memory_space<vmem>>, vector<3x16x1xf32>
    tpu.vector_store %arg2[%c0_154, %c0_155, %c14_156], %138 {strides = array<i32>} : memref<3x16x16xf32, #tpu.memory_space<vmem>>, vector<3x16x1xf32>,
    %c0_157 = arith.constant 0 : index
    %c0_158 = arith.constant 0 : index
    %c13_159 = arith.constant 13 : index
    %140 = vector.load %arg3[%c0_157, %c0_158, %c13_159] : memref<3x16x16xf32, #tpu.memory_space<vmem>>, vector<3x16x1xf32>
    %cst_160 = arith.constant 0.054488685 : f32
    %141 = vector.broadcast %cst_160 : f32 to vector<3x16x1xf32>
    %142 = arith.mulf %141, %140 : vector<3x16x1xf32>
    %c0_161 = arith.constant 0 : index
    %c0_162 = arith.constant 0 : index
    %c14_163 = arith.constant 14 : index
    %143 = vector.load %arg3[%c0_161, %c0_162, %c14_163] : memref<3x16x16xf32, #tpu.memory_space<vmem>>, vector<3x16x1xf32>
    %cst_164 = arith.constant 0.244201347 : f32
    %144 = vector.broadcast %cst_164 : f32 to vector<3x16x1xf32>
    %145 = arith.mulf %144, %143 : vector<3x16x1xf32>
    %146 = arith.addf %142, %145 : vector<3x16x1xf32>
    %c0_165 = arith.constant 0 : index
    %c0_166 = arith.constant 0 : index
    %c15_167 = arith.constant 15 : index
    %147 = vector.load %arg3[%c0_165, %c0_166, %c15_167] : memref<3x16x16xf32, #tpu.memory_space<vmem>>, vector<3x16x1xf32>
    %cst_168 = arith.constant 0.701309978 : f32
    %148 = vector.broadcast %cst_168 : f32 to vector<3x16x1xf32>
    %149 = arith.mulf %148, %147 : vector<3x16x1xf32>
    %150 = arith.addf %146, %149 : vector<3x16x1xf32>
    %c0_169 = arith.constant 0 : index
    %c0_170 = arith.constant 0 : index
    %c15_171 = arith.constant 15 : index
    %151 = vector.load %arg2[%c0_169, %c0_170, %c15_171] : memref<3x16x16xf32, #tpu.memory_space<vmem>>, vector<3x16x1xf32>
    tpu.vector_store %arg2[%c0_169, %c0_170, %c15_171], %150 {strides = array<i32>} : memref<3x16x16xf32, #tpu.memory_space<vmem>>, vector<3x16x1xf32>,
    return
  }
  func.func @transform_0(%arg0: i32) -> (i32, i32, i32) {
    %c0_i32 = arith.constant 0 : i32
    %c0_i32_0 = arith.constant 0 : i32
    %c0_i32_1 = arith.constant 0 : i32
    return %arg0, %c0_i32, %c0_i32_0 : i32, i32, i32
  }
  func.func @transform_1(%arg0: i32) -> (i32, i32, i32) {
    %c0_i32 = arith.constant 0 : i32
    %c0_i32_0 = arith.constant 0 : i32
    %c0_i32_1 = arith.constant 0 : i32
    return %arg0, %c0_i32, %c0_i32_0 : i32, i32, i32
  }
}

</mosaic_0001>

<bundles_post_ra>
// kernel: gaussian_blur.1
= control target key start
LH: loop header
LB: loop body
LE: loop exit
PB: predicated region body
PF: predicated region fallthrough
CT: control target
= control target key end

     0   :  { %6 = vsyncpa [#allocation4], 0  ;;  %s1941_s0 = inlined_call_operand.hbm [shape: f32[6,16,16], index: 0, kind: input, shape index: {}]   ;;  %s1942_s1 = inlined_call_operand.hbm [shape: f32[6,16,16], index: 1, kind: output, shape index: {}]  }
   0x1   :  { %8 = vsyncpa [#allocation4 + $0x1], 0 }
   0x2   :  { %9 = vsyncpa [#allocation5], 0 }
   0x3   :  { %11 = vsyncpa [#allocation5 + $0x1], 0  ;;  %s1316_s6 = smov 0   ;;  %s1318_s7 = smov 0  }
   0x4   :  { %s1320_s8 = smov 0   ;;  %s1322_s9 = smov 0  }
   0x5 LB: > { %s1337_s10 = sadd.s32 4294967295, %s1292_s9   ;;  %s1122_s11 = sadd.s32 4294967294, %s1292_s9   ;;  %s1292_s9 = sphi %s1322_s9, %s1954_s9   ;;  %s1288_s8 = sphi %s1320_s8, %s1953_s8   ;;  %s1284_s7 = sphi %s1318_s7, %s1952_s7   ;;  %s1280_s6 = sphi %s1316_s6, %s1951_s6  }
   0x6   : > { %s1341_s12 = sadd.s32 1, %s1292_s9   ;;  %s24_s13 = sadd.s32 1, %s1288_s8 }
   0x7   : > { %s21_s14 = ssub.s32 %s1292_s9, %s1341_s12  ;;  %p31_p0 = scmp.ne.s32.totalorder %s1288_s8, %s1284_s7 }
   0x8   : > { %p22_p1 = scmp.eq.s32.totalorder %s21_s14, 0  ;;  %p32_p2 = scmp.eq.s32.totalorder %s1292_s9, 0 }
   0x9   : > { %p37_p3 = scmp.ne.s32.totalorder %s1284_s7, %s1280_s6  ;;  %p38_p4 = scmp.eq.s32.totalorder %s1337_s10, 0 }
   0xa   : > { %s1353_s15 = scalar_select %p22_p1, %s1288_s8, %s24_s13  }
   0xb   : > { %p33_p5 = por %p32_p2, %p31_p0  ;;  %p1355_p6 = por %p38_p4, %p37_p3 }
   0xc   : > { %p61_p7 = scmp.eq.s32.totalorder %s1337_s10, 1  ;;  %p67_p8 = scmp.eq.s32.totalorder %s1122_s11, 1 }
   0xd   : > { %p1152_p10 = scmp.lt.s32.totalorder %s1292_s9, 2  ;;  %s87_s19 = sand.u32 1, %s1288_s8  }
   0xe   : > { %p1362_p11 = por %p61_p7, %p31_p0  ;;  %p1366_p12 = por %p67_p8, %p37_p3 }
   0xf   : > { %s1136_s20 = smul.u32 768, %s1292_s9  ;;  %p1377_p13 = pnand %p1152_p10, %p33_p5 }
  0x10   : > { %s1945_s17 = scalar_select %p1362_p11, 1, 0 }
  0x11   : > { %s1946_s18 = scalar_select %p1366_p12, 1, 0 }
  0x12   : > { %s1138_s21 = smul.u32 48, %s87_s19  ;;  %s1375_s24 = scalar_lea.hbm %s1941_s0, %s1136_s20 }
  0x13   : > { %s1383_s28 = scalar_lea.sflag [#allocation4], %s87_s19  ;;  %s1196_s29 = scalar_lea.hbm %s1375_s24, 768 }
  0x14   : > { %s91_s26 = scalar_lea.vmem [#allocation3], %s1138_s21  ;;  %p1197_p0 = scmp.ne.s32.totalorder %s1375_s24, %s1196_s29 }
  0x15   : > { %s99_s27 = sshll.u32 %s91_s26, 4  ;;  %p1198_p1 = pneg %p1377_p13  ;;  %s1381_s27 = int_to_ptr.vmem [resolvable:$true] %s99_s27 }
  0x16   : > { %s1201_s3 = scalar_lea.hbm %s1941_s0, 1536  ;;  %p1202_p4 = scmp.lt.u32.totalorder %s1375_s24, %s1941_s0 }
  0x17   : > { %p1199_p2 = pnand %p1198_p1, %p1197_p0  ;;  %p1203_p5 = scmp.lt.u32.totalorder %s1201_s3, %s1196_s29 }
  0x18   : > { %p1205_p8 = scmp.lt.u32.totalorder %s1196_s29, %s1375_s24 }
  0x19   : > { %p1200_p3 = pneg %p1199_p2  ;;  %p1204_p7 = por %p1203_p5, %p1202_p4 }
  0x1b   : > { %p1206_p10 = por %p1205_p8, %p1204_p7 }
  0x1d   : > { %p1207_p9 = pnand %p1206_p10, %p1200_p3 }
  0x1f   : > { %1210 = shalt.err (!%p1207_p9)
}
  0x20   : > { %s1211_s11 = scalar_lea.vmem %s1381_s27, 768  ;;  %s1294_s13 = smov [#allocation3]  }
  0x21   : > { %p1212_p0 = scmp.ne.s32.totalorder %s1381_s27, %s1211_s11  ;;  %s1216_s14 = sshll.u32 %s1294_s13, 4  ;;  %s1217_s14 = int_to_ptr.vmem [resolvable:$false] %s1216_s14 }
  0x22   : > { %s1218_s19 = scalar_lea.vmem %s1217_s14, 1536  ;;  %p1219_p11 = scmp.lt.s32.totalorder %s1381_s27, %s1217_s14 }
  0x23   : > { %p1214_p2 = pnand %p1212_p0, %p1198_p1  ;;  %p1220_p4 = scmp.lt.s32.totalorder %s1218_s19, %s1211_s11 }
  0x25   : > { %p1215_p12 = pneg %p1214_p2  ;;  %p1221_p5 = por %p1220_p4, %p1219_p11 }
  0x27   : > { %p1222_p7 = pnand %p1221_p5, %p1215_p12 }
  0x29   : > { %1225 = shalt.err (!%p1222_p7)
}
  0x2a   : > { %s1295_s20 = smov 128   ;;  %s1296_s21 = smov 8  }
  0x2b   : > { %1147 = dma.hbm_to_vmem [thread:$0]  (!%p1377_p13), %s1375_s24, 768, %s1381_s27, %s1383_s28, %s1295_s20, %s1295_s20, %s1296_s21  }
  0x2c   : > { %p1127_p9 = scmp.ge.s32.totalorder %s1292_s9, 1  ;;  %p107_p1 = scmp.lt.s32.totalorder %s1292_s9, 3 }
  0x2e   : > { %p108_p3 = pnand %p1127_p9, %p107_p1 }
  0x2f   : > { %s1414_s22 = sand.u32 (!%p108_p3), 1, %s1284_s7  }
  0x30   : > { %111 = sbr.rel (%p108_p3) target bundleno = 554 (0x22a), region = 24  ;;  %s114_s26 = scalar_lea.sflag (!%p108_p3), [#allocation4], %s1414_s22 }
  0x31   : > { %s1139_s23 = smul.u32 (!%p108_p3), 48, %s1414_s22 }
  0x33   : > { %s1420_s29 = scalar_lea.vmem (!%p108_p3), [#allocation3], %s1139_s23 }
  0x37   : > { %1271 = dma.done.wait (%p1355_p6), %s114_s26, 768  }
  0x38   : > { %1273 = vsyncadd (%p1355_p6), %s114_s26, 4294966528  ;;  %v140_v0 = vld [vmem:[%s1420_s29 + $0x10] sm:$0xff]  ;;  %v138_v27 = vld [vmem:[%s1420_s29] sm:$0xff]  ;;  %vm222_vm0 = vcmask 130048   ;;  %vm254_vm1 = vcmask 122880   ;;  %vm224_vm2 = vcmask 125952  }
  0x39   : > { %v152_v1 = vld [vmem:[%s1420_s29 + $0x11] sm:$0xff]  ;;  %v146_v3 = vmul.f32 0.054488685, %v140_v0  ;;  %v231_v8 = vld [vmem:[%s1420_s29 + $0x10] sm:$0x1]  ;;  %v150_v28 = vld [vmem:[%s1420_s29 + $0x1] sm:$0xff] }
  0x3a   : > { %v170_v2 = vld [vmem:[%s1420_s29 + $0x12] sm:$0xff]  ;;  %v158_v4 = vmul.f32 0.24420135, %v152_v1  ;;  %v234_v12 = vmul.f32 0.70131, %v231_v8  ;;  %v168_v35 = vld [vmem:[%s1420_s29 + $0x2] sm:$0xff] }
  0x3b   : > { %v176_v5 = vmul.f32 0.40261996, %v170_v2  ;;  %v188_v6 = vld [vmem:[%s1420_s29 + $0x13] sm:$0xff]  ;;  %v237_v13 = vld [vmem:[%s1420_s29 + $0x11] sm:$0x1]  ;;  %v186_v36 = vld [vmem:[%s1420_s29 + $0x3] sm:$0xff] }
  0x3c   : > { %v206_v7 = vld [vmem:[%s1420_s29 + $0x14] sm:$0xff]  ;;  %v164_v9 = vadd.f32 %v158_v4, %v146_v3  ;;  %v194_v10 = vmul.f32 0.24420135, %v188_v6  ;;  %v246_v14 = vld [vmem:[%s1420_s29 + $0x12] sm:$0x1]  ;;  %v204_v37 = vld [vmem:[%s1420_s29 + $0x4] sm:$0xff] }
  0x3d   : > { %v212_v11 = vmul.f32 0.054488685, %v206_v7  ;;  %v259_v15 = vld [vmem:[%s1420_s29 + $0x10] sm:$0x1]  ;;  %v240_v17 = vmul.f32 0.24420135, %v237_v13 }
  0x3e   : > { %v182_v16 = vadd.f32 %v176_v5, %v164_v9  ;;  %v249_v18 = vmul.f32 0.054488685, %v246_v14  ;;  %v262_v19 = vmul.f32 0.29869002, %v259_v15  ;;  %v265_v20 = vld [vmem:[%s1420_s29 + $0x11] sm:$0x1] }
  0x3f   : > { %v274_v21 = vld [vmem:[%s1420_s29 + $0x12] sm:$0x1]  ;;  %v283_v22 = vld [vmem:[%s1420_s29 + $0x13] sm:$0x1]  ;;  %v243_v24 = vadd.f32 %v240_v17, %v234_v12  ;;  %v268_v25 = vmul.f32 0.40261996, %v265_v20 }
  0x40   : > { %v200_v23 = vadd.f32 %v194_v10, %v182_v16  ;;  %v277_v26 = vmul.f32 0.24420135, %v274_v21  ;;  %v144_v29 = vmul.f32 0.054488685, %v138_v27  ;;  %v156_v30 = vmul.f32 0.24420135, %v150_v28 }
  0x41   : > { %v252_v32 = vadd.f32 %v249_v18, %v243_v24  ;;  %v271_v33 = vadd.f32 %v268_v25, %v262_v19  ;;  %v286_v34 = vmul.f32 0.054488685, %v283_v22  ;;  %v174_v39 = vmul.f32 0.40261996, %v168_v35  ;;  %v230_v43 = vld [vmem:[%s1420_s29] sm:$0x1] }
  0x42   : > { %v218_v31 = vadd.f32 %v212_v11, %v200_v23  ;;  %v162_v38 = vadd.f32 %v156_v30, %v144_v29  ;;  %v192_v40 = vmul.f32 0.24420135, %v186_v36  ;;  %v210_v41 = vmul.f32 0.054488685, %v204_v37  ;;  %v236_v44 = vld [vmem:[%s1420_s29 + $0x1] sm:$0x1] }
  0x43   : > { %256 = vst.msk [vmem:[#allocation2 + $0x10] sm:$0x1] %vm254_vm1, %v252_v32  ;;  %v280_v42 = vadd.f32 %v277_v26, %v271_v33  ;;  %v245_v45 = vld [vmem:[%s1420_s29 + $0x2] sm:$0x1]  ;;  %v233_v47 = vmul.f32 0.70131, %v230_v43 }
  0x44   : > { %226 = vst.msk [vmem:[#allocation2 + $0x12] sm:$0xff] %vm222_vm0, %v218_v31  ;;  %v180_v46 = vadd.f32 %v174_v39, %v162_v38  ;;  %v239_v48 = vmul.f32 0.24420135, %v236_v44  ;;  %v248_v49 = vmul.f32 0.054488685, %v245_v45  ;;  %s1297_s16 = smov 127  }
  0x45   : > { %v289_v50 = vadd.f32 %v286_v34, %v280_v42  ;;  %v258_v51 = vld [vmem:[%s1420_s29] sm:$0x1]  ;;  %v264_v52 = vld [vmem:[%s1420_s29 + $0x1] sm:$0x1]  ;;  %v273_v53 = vld [vmem:[%s1420_s29 + $0x2] sm:$0x1] }
  0x46   : > { %v198_v54 = vadd.f32 %v192_v40, %v180_v46  ;;  %v242_v55 = vadd.f32 %v239_v48, %v233_v47  ;;  %v261_v56 = vmul.f32 0.29869002, %v258_v51  ;;  %v267_v57 = vmul.f32 0.40261996, %v264_v52  ;;  %v282_v58 = vld [vmem:[%s1420_s29 + $0x3] sm:$0x1] }
  0x47   : > { %292 = vst.msk [vmem:[#allocation2 + $0x11] sm:$0x1] %vm254_vm1, %v289_v50  ;;  %v276_v59 = vmul.f32 0.24420135, %v273_v53  ;;  %v285_v60 = vmul.f32 0.054488685, %v282_v58 }
  0x48   : > { %v141_v61 = vld [vmem:[%s1420_s29 + $0x18] sm:$0xf]  ;;  %v216_v62 = vadd.f32 %v210_v41, %v198_v54  ;;  %v251_v63 = vadd.f32 %v248_v49, %v242_v55  ;;  %v270_v0 = vadd.f32 %v267_v57, %v261_v56  ;;  %v207_v9 = vld [vmem:[%s1420_s29 + $0x1c] sm:$0xf]  ;;  %v139_v33 = vld [vmem:[%s1420_s29 + $0x8] sm:$0xf] }
  0x49   : > { %v147_v1 = vmul.f32 0.054488685, %v141_v61  ;;  %v153_v2 = vld [vmem:[%s1420_s29 + $0x19] sm:$0xf]  ;;  %v213_v12 = vmul.f32 0.054488685, %v207_v9 }
  0x4a   : > { %v171_v3 = vld [vmem:[%s1420_s29 + $0x1a] sm:$0xf]  ;;  %v159_v4 = vmul.f32 0.24420135, %v153_v2  ;;  %223 = vst.msk [vmem:[#allocation2 + $0x2] sm:$0xff] %vm222_vm0, %v216_v62  ;;  %v279_v7 = vadd.f32 %v276_v59, %v270_v0  ;;  %v142_v52 = vld [vmem:[%s1420_s29 + $0x20] sm:$0xff] }
  0x4b   : > { %v177_v5 = vmul.f32 0.40261996, %v171_v3  ;;  %v189_v6 = vld [vmem:[%s1420_s29 + $0x1b] sm:$0xf]  ;;  %255 = vst.msk [vmem:[#allocation2] sm:$0x1] %vm254_vm1, %v251_v63 }
  0x4c   : > { %v195_v8 = vmul.f32 0.24420135, %v189_v6  ;;  %v295_v10 = vld [vmem:[%s1420_s29 + $0x1c] sm:$0x1]  ;;  %v165_v11 = vadd.f32 %v159_v4, %v147_v1  ;;  %v301_v14 = vld [vmem:[%s1420_s29 + $0x1d] sm:$0x1]  ;;  %v288_v15 = vadd.f32 %v285_v60, %v279_v7 }
  0x4d   : > { %v298_v13 = vmul.f32 0.054488685, %v295_v10  ;;  %v304_v16 = vmul.f32 0.24420135, %v301_v14  ;;  %v310_v17 = vld [vmem:[%s1420_s29 + $0x1e] sm:$0x1] }
  0x4e   : > { %v319_v18 = vld [vmem:[%s1420_s29 + $0x1f] sm:$0x1]  ;;  %v183_v19 = vadd.f32 %v177_v5, %v165_v11  ;;  %v313_v20 = vmul.f32 0.40261996, %v310_v17  ;;  %v331_v22 = vld [vmem:[%s1420_s29 + $0x1d] sm:$0x1] }
  0x4f   : > { %v322_v21 = vmul.f32 0.29869002, %v319_v18  ;;  %v1465_v23 = vld [vmem:[#allocation2 + $0x10] sm:$0xff]  ;;  %291 = vst.msk [vmem:[#allocation2 + $0x1] sm:$0x1] %vm254_vm1, %v288_v15  ;;  %v307_v24 = vadd.f32 %v304_v16, %v298_v13  ;;  %s1298_s24 = smov 126  }
  0x50   : > { %v334_v25 = vmul.f32 0.054488685, %v331_v22  ;;  %v337_v26 = vld [vmem:[%s1420_s29 + $0x1e] sm:$0x1]  ;;  %v1470_v27 = vmul.f32 0.24420135, %v1465_v23  ;;  %v201_v28 = vadd.f32 %v195_v8, %v183_v19 }
  0x51   : > { %v340_v29 = vmul.f32 0.24420135, %v337_v26  ;;  %v346_v30 = vld [vmem:[%s1420_s29 + $0x1f] sm:$0x1]  ;;  %v316_v31 = vadd.f32 %v313_v20, %v307_v24  ;;  %v151_v34 = vld [vmem:[%s1420_s29 + $0x9] sm:$0xf] }
  0x52   : > { %v349_v32 = vmul.f32 0.70131, %v346_v30  ;;  %385 = vrot.lane.b32.xlu1 %v1470_v27, %s1297_s16  ;;  %v219_v35 = vadd.f32 %v213_v12, %v201_v28  ;;  %v145_v37 = vmul.f32 0.054488685, %v139_v33  ;;  %v157_v38 = vmul.f32 0.24420135, %v151_v34 }
  0x53   : > { %v343_v36 = vadd.f32 %v340_v29, %v334_v25  ;;  %v169_v39 = vld [vmem:[%s1420_s29 + $0xa] sm:$0xf]  ;;  %v325_v40 = vadd.f32 %v322_v21, %v316_v31  ;;  %v309_v51 = vld [vmem:[%s1420_s29 + $0xe] sm:$0x1]  ;;  %v154_v57 = vld [vmem:[%s1420_s29 + $0x21] sm:$0xff]  ;;  %s1299_s25 = smov 125  }
  0x54   : > { %v175_v41 = vmul.f32 0.40261996, %v169_v39  ;;  %v187_v42 = vld [vmem:[%s1420_s29 + $0xb] sm:$0xf]  ;;  %227 = vst.msk [vmem:[#allocation2 + $0x1a] sm:$0xf] %vm224_vm2, %v219_v35  ;;  %v163_v45 = vadd.f32 %v157_v38, %v145_v37 }
  0x55   : > { %v205_v43 = vld [vmem:[%s1420_s29 + $0xc] sm:$0xf]  ;;  %v352_v44 = vadd.f32 %v349_v32, %v343_v36  ;;  %v193_v46 = vmul.f32 0.24420135, %v187_v42  ;;  %328 = vst.msk [vmem:[#allocation2 + $0x1e] sm:$0x1] %vm254_vm1, %v325_v40 }
  0x56   : > { %v211_v47 = vmul.f32 0.054488685, %v205_v43  ;;  %v294_v48 = vld [vmem:[%s1420_s29 + $0xc] sm:$0x1]  ;;  %v300_v50 = vld [vmem:[%s1420_s29 + $0xd] sm:$0x1]  ;;  %v181_v54 = vadd.f32 %v175_v41, %v163_v45 }
  0x57   : > { %v297_v49 = vmul.f32 0.054488685, %v294_v48  ;;  %v1486_v53 = vld [vmem:[#allocation2] sm:$0xff]  ;;  %355 = vst.msk [vmem:[#allocation2 + $0x1f] sm:$0x1] %vm254_vm1, %v352_v44  ;;  %s1300_s27 = smov 124  }
  0x58   : > { %v303_v55 = vmul.f32 0.24420135, %v300_v50  ;;  %v312_v56 = vmul.f32 0.40261996, %v309_v51  ;;  %v1491_v58 = vmul.f32 0.24420135, %v1486_v53  ;;  %v199_v61 = vadd.f32 %v193_v46, %v181_v54 }
  0x59   : > { %v318_v59 = vld [vmem:[%s1420_s29 + $0xf] sm:$0x1]  ;;  %v330_v60 = vld [vmem:[%s1420_s29 + $0xd] sm:$0x1]  ;;  %v336_v1 = vld [vmem:[%s1420_s29 + $0xe] sm:$0x1] }
  0x5a   : > { %v306_v62 = vadd.f32 %v303_v55, %v297_v49  ;;  %v321_v63 = vmul.f32 0.29869002, %v318_v59  ;;  %v333_v0 = vmul.f32 0.054488685, %v330_v60  ;;  %381 = vrot.lane.b32.xlu0 %v1491_v58, %s1297_s16  ;;  %v339_v2 = vmul.f32 0.24420135, %v336_v1 }
  0x5b   : > { %v345_v3 = vld [vmem:[%s1420_s29 + $0xf] sm:$0x1]  ;;  %v143_v4 = vld [vmem:[%s1420_s29 + $0x28] sm:$0xf]  ;;  %v217_v5 = vadd.f32 %v211_v47, %v199_v61  ;;  %v148_v8 = vmul.f32 0.054488685, %v142_v52 }
  0x5c   : > { %v315_v6 = vadd.f32 %v312_v56, %v306_v62  ;;  %v348_v7 = vmul.f32 0.70131, %v345_v3  ;;  %v155_v9 = vld [vmem:[%s1420_s29 + $0x29] sm:$0xf]  ;;  %v342_v10 = vadd.f32 %v339_v2, %v333_v0  ;;  %v149_v11 = vmul.f32 0.054488685, %v143_v4 }
  0x5d   : > { %v160_v12 = vmul.f32 0.24420135, %v154_v57  ;;  %v161_v13 = vmul.f32 0.24420135, %v155_v9  ;;  %225 = vst.msk [vmem:[#allocation2 + $0xa] sm:$0xf] %vm224_vm2, %v217_v5 }
  0x5e   : > { %v324_v14 = vadd.f32 %v321_v63, %v315_v6  ;;  %v172_v15 = vld [vmem:[%s1420_s29 + $0x22] sm:$0xff]  ;;  %v173_v16 = vld [vmem:[%s1420_s29 + $0x2a] sm:$0xf]  ;;  %v351_v19 = vadd.f32 %v348_v7, %v342_v10  ;;  %v311_v41 = vld [vmem:[%s1420_s29 + $0x2e] sm:$0x1]  ;;  %s1301_s28 = smov 2  }
  0x5f   : > { %v190_v17 = vld [vmem:[%s1420_s29 + $0x23] sm:$0xff]  ;;  %v166_v20 = vadd.f32 %v160_v12, %v148_v8  ;;  %v167_v21 = vadd.f32 %v161_v13, %v149_v11  ;;  %v178_v22 = vmul.f32 0.40261996, %v172_v15  ;;  %v191_v24 = vld [vmem:[%s1420_s29 + $0x2b] sm:$0xf]  ;;  %s1302_s30 = smov 1  }
  0x60   : > { %v1505_v18 = vld [vmem:[#allocation2 + $0x18] sm:$0xff]  ;;  %327 = vst.msk [vmem:[#allocation2 + $0xe] sm:$0x1] %vm254_vm1, %v324_v14  ;;  %v179_v28 = vmul.f32 0.40261996, %v173_v16  ;;  %vm519_vm3 = vcmask 113680  }
  0x61   : > { %v208_v25 = vld [vmem:[%s1420_s29 + $0x24] sm:$0xff]  ;;  %v1510_v26 = vmul.f32 0.24420135, %v1505_v18  ;;  %v196_v29 = vmul.f32 0.24420135, %v190_v17  ;;  %v184_v30 = vadd.f32 %v178_v22, %v166_v20  ;;  %vm610_vm4 = vcmask 7168  }
  0x62   : > { %354 = vst.msk [vmem:[#allocation2 + $0xf] sm:$0x1] %vm254_vm1, %v351_v19  ;;  %v197_v31 = vmul.f32 0.24420135, %v191_v24  ;;  %v209_v32 = vld [vmem:[%s1420_s29 + $0x2c] sm:$0xf]  ;;  %v185_v34 = vadd.f32 %v179_v28, %v167_v21 }
  0x63   : > { %v214_v33 = vmul.f32 0.054488685, %v208_v25  ;;  %387 = vrot.lane.b32.xlu1 %v1510_v26, %s1297_s16  ;;  %v215_v35 = vmul.f32 0.054488685, %v209_v32  ;;  %v296_v36 = vld [vmem:[%s1420_s29 + $0x2c] sm:$0x1]  ;;  %v202_v38 = vadd.f32 %v196_v29, %v184_v30 }
  0x64   : > { %v302_v37 = vld [vmem:[%s1420_s29 + $0x2d] sm:$0x1]  ;;  %v299_v39 = vmul.f32 0.054488685, %v296_v36  ;;  %v203_v42 = vadd.f32 %v197_v31, %v185_v34  ;;  %v314_v43 = vmul.f32 0.40261996, %v311_v41 }
  0x65   : > { %v305_v40 = vmul.f32 0.24420135, %v302_v37  ;;  %v320_v44 = vld [vmem:[%s1420_s29 + $0x2f] sm:$0x1]  ;;  %v332_v45 = vld [vmem:[%s1420_s29 + $0x2d] sm:$0x1]  ;;  %v220_v46 = vadd.f32 %v214_v33, %v202_v38 }
  0x66   : > { %v323_v48 = vmul.f32 0.29869002, %v320_v44  ;;  %v335_v49 = vmul.f32 0.054488685, %v332_v45  ;;  %v338_v50 = vld [vmem:[%s1420_s29 + $0x2e] sm:$0x1]  ;;  %v221_v51 = vadd.f32 %v215_v35, %v203_v42 }
  0x67   : > { %v308_v47 = vadd.f32 %v305_v40, %v299_v39  ;;  %v341_v52 = vmul.f32 0.24420135, %v338_v50  ;;  %v347_v54 = vld [vmem:[%s1420_s29 + $0x2f] sm:$0x1]  ;;  %v232_v55 = vld [vmem:[%s1420_s29 + $0x20] sm:$0x1] }
  0x68   : > { %228 = vst.msk [vmem:[#allocation2 + $0x22] sm:$0xff] %vm222_vm0, %v220_v46  ;;  %v350_v57 = vmul.f32 0.70131, %v347_v54  ;;  %v235_v59 = vmul.f32 0.70131, %v232_v55  ;;  %s1798_s2 = scalar_lea.vmem [#allocation6], %s1139_s23 }
  0x69   : > { %v317_v56 = vadd.f32 %v314_v43, %v308_v47  ;;  %v238_v60 = vld [vmem:[%s1420_s29 + $0x21] sm:$0x1]  ;;  %v1527_v61 = vld [vmem:[#allocation2 + $0x8] sm:$0xff]  ;;  %229 = vst.msk [vmem:[#allocation2 + $0x2a] sm:$0xf] %vm224_vm2, %v221_v51  ;;  %v344_v62 = vadd.f32 %v341_v52, %v335_v49  ;;  %vm761_vm5 = vcmask 15368  }
  0x6a   : > { %v241_v63 = vmul.f32 0.24420135, %v238_v60  ;;  %v247_v0 = vld [vmem:[%s1420_s29 + $0x22] sm:$0x1]  ;;  %v1532_v1 = vmul.f32 0.24420135, %v1527_v61 }
  0x6b   : > { %v326_v2 = vadd.f32 %v323_v48, %v317_v56  ;;  %v250_v3 = vmul.f32 0.054488685, %v247_v0  ;;  %v260_v4 = vld [vmem:[%s1420_s29 + $0x20] sm:$0x1]  ;;  %v353_v5 = vadd.f32 %v350_v57, %v344_v62  ;;  %v266_v8 = vld [vmem:[%s1420_s29 + $0x21] sm:$0x1] }
  0x6c   : > { %v244_v6 = vadd.f32 %v241_v63, %v235_v59  ;;  %v263_v7 = vmul.f32 0.29869002, %v260_v4  ;;  %v275_v9 = vld [vmem:[%s1420_s29 + $0x22] sm:$0x1]  ;;  %383 = vrot.lane.b32.xlu0 %v1532_v1, %s1297_s16  ;;  %v269_v10 = vmul.f32 0.40261996, %v266_v8 }
  0x6d   : > { %329 = vst.msk [vmem:[#allocation2 + $0x2e] sm:$0x1] %vm254_vm1, %v326_v2  ;;  %v278_v11 = vmul.f32 0.24420135, %v275_v9  ;;  %v284_v12 = vld [vmem:[%s1420_s29 + $0x23] sm:$0x1] }
  0x6e   : > { %356 = vst.msk [vmem:[#allocation2 + $0x2f] sm:$0x1] %vm254_vm1, %v353_v5  ;;  %v253_v13 = vadd.f32 %v250_v3, %v244_v6  ;;  %v272_v14 = vadd.f32 %v269_v10, %v263_v7  ;;  %v287_v15 = vmul.f32 0.054488685, %v284_v12  ;;  %v1552_v21 = vmul.f32 0.40261996, %v1527_v61 }
  0x6f   : > { %v1559_v24 = vmul.f32 0.40261996, %v1505_v18  ;;  %v405_v28 = vmul.f32 0.40261996, %v1486_v53  ;;  %v407_v30 = vmul.f32 0.40261996, %v1465_v23 }
  0x70   : > { %257 = vst.msk [vmem:[#allocation2 + $0x20] sm:$0x1] %vm254_vm1, %v253_v13  ;;  %v281_v16 = vadd.f32 %v278_v11, %v272_v14  ;;  %v1585_v32 = vmul.f32 0.054488685, %v1527_v61  ;;  %v1591_v33 = vmul.f32 0.054488685, %v1505_v18 }
  0x71   : > { %v1596_v34 = vmul.f32 0.054488685, %v1486_v53  ;;  %v1604_v36 = vmul.f32 0.054488685, %v1465_v23  ;;  %v533_v14 = vmul.f32 0.70131, %v1527_v61 }
  0x72   : > { %v290_v17 = vadd.f32 %v287_v15, %v281_v16  ;;  %vm912_vm6 = vcmask 121968   ;;  %vm1027_vm7 = vcmask 130168   ;;  %s1137_s3 = smul.u32 768, %s1337_s10  ;;  %s1049_s4 = sshll.u32 %s1798_s2, 4  ;;  %s1895_s4 = int_to_ptr.vmem [resolvable:$true] %s1049_s4 }
  0x73   : > { %s1035_s14 = scalar_lea.sflag [#allocation5], %s1414_s22  ;;  %s1226_s19 = scalar_lea.vmem %s1895_s4, 768 }
  0x74   : > { %293 = vst.msk [vmem:[#allocation2 + $0x21] sm:$0x1] %vm254_vm1, %v290_v17  ;;  %s1893_s13 = scalar_lea.hbm %s1942_s1, %s1137_s3  ;;  %p1227_p6 = scmp.ne.s32.totalorder %s1895_s4, %s1226_s19 }
  0x75   : > { %v1543_v19 = vld [vmem:[#allocation2 + $0x28] sm:$0xff]  ;;  %p1948_p11 = scmp.ne.s32.totalorder %s1945_s17, 0  ;;  %s1303_s10 = smov [#allocation6]  }
  0x76   : > { %v1547_v20 = vmul.f32 0.24420135, %v1543_v19  ;;  %v410_v29 = vmul.f32 0.40261996, %v1543_v19  ;;  %v1600_v35 = vmul.f32 0.054488685, %v1543_v19 }
  0x77   : > { %p1228_p12 = pnand %p1227_p6, %p1948_p11  ;;  %s1230_s20 = sshll.u32 %s1303_s10, 4  ;;  %s1231_s20 = int_to_ptr.vmem [resolvable:$false] %s1230_s20 }
  0x78   : > { %391 = vrot.lane.b32.xlu1 %v1547_v20, %s1297_s16  ;;  %s1232_s21 = scalar_lea.vmem %s1231_s20, 1536  ;;  %p1233_p8 = scmp.lt.s32.totalorder %s1895_s4, %s1231_s20 }
  0x79   : > { %p1229_p13 = pneg %p1228_p12  ;;  %p1234_p10 = scmp.lt.s32.totalorder %s1232_s21, %s1226_s19 }
  0x7b   : > { %v1554_v22 = vld [vmem:[#allocation2 + $0x20] sm:$0xff]  ;;  %p1235_p0 = por %p1234_p10, %p1233_p8 }
  0x7c   : > { %419 = vrot.lane.b32.xlu1 %v1552_v21, %s1298_s24  ;;  %v1562_v25 = vmul.f32 0.24420135, %v1554_v22  ;;  %v409_v31 = vmul.f32 0.40261996, %v1554_v22  ;;  %v1609_v37 = vmul.f32 0.054488685, %v1554_v22 }
  0x7d   : > { %p1236_p2 = pnand %p1235_p0, %p1229_p13 }
  0x7e   : > { %389 = vrot.lane.b32.xlu0 %v1562_v25, %s1297_s16 }
  0x80   : > { %423 = vrot.lane.b32.xlu1 %v1559_v24, %s1298_s24 }
  0x82   : > { %417 = vrot.lane.b32.xlu0 %v405_v28, %s1298_s24 }
  0x84   : > { %427 = vrot.lane.b32.xlu1 %v410_v29, %s1298_s24 }
  0x86   : > { %421 = vrot.lane.b32.xlu0 %v407_v30, %s1298_s24 }
  0x88   : > { %443 = vrot.lane.b32.xlu1 %v1532_v1, %s1299_s25 }
  0x8a   : > { %425 = vrot.lane.b32.xlu0 %v409_v31, %s1298_s24 }
  0x8c   : > { %447 = vrot.lane.b32.xlu1 %v1510_v26, %s1299_s25 }
  0x8e   : > { %441 = vrot.lane.b32.xlu0 %v1491_v58, %s1299_s25 }
  0x90   : > { %451 = vrot.lane.b32.xlu1 %v1547_v20, %s1299_s25 }
  0x92   : > { %445 = vrot.lane.b32.xlu0 %v1470_v27, %s1299_s25 }
  0x94   : > { %473 = vrot.lane.b32.xlu1 %v1585_v32, %s1300_s27 }
  0x96   : > { %449 = vrot.lane.b32.xlu0 %v1562_v25, %s1299_s25 }
  0x98   : > { %477 = vrot.lane.b32.xlu1 %v1591_v33, %s1300_s27 }
  0x9a   : > { %471 = vrot.lane.b32.xlu0 %v1596_v34, %s1300_s27 }
  0x9c   : > { %481 = vrot.lane.b32.xlu1 %v1600_v35, %s1300_s27 }
  0x9e   : > { %475 = vrot.lane.b32.xlu0 %v1604_v36, %s1300_s27 }
  0xa0   : > { %552 = vrot.lane.b32.xlu1 %v1532_v1, %s1297_s16 }
  0xa2   : > { %479 = vrot.lane.b32.xlu0 %v1609_v37, %s1300_s27 }
  0xa4   : > { %556 = vrot.lane.b32.xlu1 %v1510_v26, %s1297_s16 }
  0xa6   : > { %550 = vrot.lane.b32.xlu0 %v1491_v58, %s1297_s16 }
  0xa8   : > { %560 = vrot.lane.b32.xlu1 %v1547_v20, %s1297_s16 }
  0xaa   : > { %554 = vrot.lane.b32.xlu0 %v1470_v27, %s1297_s16 }
  0xac   : > { %588 = vrot.lane.b32.xlu1 %v1585_v32, %s1298_s24 }
  0xae   : > { %558 = vrot.lane.b32.xlu0 %v1562_v25, %s1297_s16 }
  0xb0   : > { %592 = vrot.lane.b32.xlu1 %v1591_v33, %s1298_s24 }
  0xb2   : > { %586 = vrot.lane.b32.xlu0 %v1596_v34, %s1298_s24 }
  0xb4   : > { %596 = vrot.lane.b32.xlu1 %v1600_v35, %s1298_s24 }
  0xb6   : > { %590 = vrot.lane.b32.xlu0 %v1604_v36, %s1298_s24 }
  0xb8   : > { %643 = vrot.lane.b32.xlu1 %v1552_v21, %s1297_s16 }
  0xba   : > { %594 = vrot.lane.b32.xlu0 %v1609_v37, %s1298_s24 }
  0xbc   : > { %647 = vrot.lane.b32.xlu1 %v1559_v24, %s1297_s16 }
  0xbe   : > { %641 = vrot.lane.b32.xlu0 %v405_v28, %s1297_s16 }
  0xc0   : > { %651 = vrot.lane.b32.xlu1 %v410_v29, %s1297_s16 }
  0xc2   : > { %645 = vrot.lane.b32.xlu0 %v407_v30, %s1297_s16 }
  0xc4   : > { %794 = vrot.lane.b32.xlu1 %v1532_v1, %s1297_s16  ;;  %v386_v38 = vpop.permute.xlu1 %385 }
  0xc5   : > { %v401_v6 = vadd.f32 %v386_v38, %v1604_v36 }
  0xc6   : > { %649 = vrot.lane.b32.xlu0 %v409_v31, %s1297_s16 }
  0xc8   : > { %798 = vrot.lane.b32.xlu1 %v1510_v26, %s1297_s16 }
  0xca   : > { %792 = vrot.lane.b32.xlu0 %v1491_v58, %s1297_s16 }
  0xcc   : > { %802 = vrot.lane.b32.xlu1 %v1547_v20, %s1297_s16  ;;  %v382_v40 = vpop.permute.xlu0 %381 }
  0xcd   : > { %v399_v0 = vadd.f32 %v382_v40, %v1596_v34 }
  0xce   : > { %796 = vrot.lane.b32.xlu0 %v1470_v27, %s1297_s16 }
  0xd0   : > { %679 = vrot.lane.b32.xlu1 %v1532_v1, %s1298_s24 }
  0xd2   : > { %800 = vrot.lane.b32.xlu0 %v1562_v25, %s1297_s16 }
  0xd4   : > { %683 = vrot.lane.b32.xlu1 %v1510_v26, %s1298_s24 }
  0xd5   : > { %v388_v39 = vpop.permute.xlu1 %387 }
  0xd6   : > { %677 = vrot.lane.b32.xlu0 %v1491_v58, %s1298_s24  ;;  %v402_v57 = vadd.f32 %v388_v39, %v1591_v33  ;;  %v1712_v39 = vmul.f32 0.29869002, %v1527_v61  ;;  %v534_v61 = vmul.f32 0.70131, %v1465_v23 }
  0xd8   : > { %687 = vrot.lane.b32.xlu1 %v1547_v20, %s1298_s24 }
  0xda   : > { %681 = vrot.lane.b32.xlu0 %v1470_v27, %s1298_s24 }
  0xdc   : > { %830 = vrot.lane.b32.xlu1 %v1552_v21, %s1298_s24 }
  0xde   : > { %685 = vrot.lane.b32.xlu0 %v1562_v25, %s1298_s24  ;;  %v384_v42 = vpop.permute.xlu0 %383 }
  0xdf   : > { %v400_v52 = vadd.f32 %v384_v42, %v1585_v32 }
  0xe0   : > { %834 = vrot.lane.b32.xlu1 %v1559_v24, %s1298_s24 }
  0xe2   : > { %828 = vrot.lane.b32.xlu0 %v405_v28, %s1298_s24 }
  0xe4   : > { %838 = vrot.lane.b32.xlu1 %v410_v29, %s1298_s24 }
  0xe6   : > { %832 = vrot.lane.b32.xlu0 %v407_v30, %s1298_s24  ;;  %v535_v30 = vmul.f32 0.70131, %v1505_v18 }
  0xe8   : > { %715 = vrot.lane.b32.xlu1 %v1585_v32, %s1299_s25 }
  0xea   : > { %v392_v41 = vpop.permute.xlu1 %391  ;;  %836 = vrot.lane.b32.xlu0 %v409_v31, %s1298_s24 }
  0xec   : > { %719 = vrot.lane.b32.xlu1 %v1591_v33, %s1299_s25 }
  0xee   : > { %v420_v43 = vpop.permute.xlu1 %419  ;;  %713 = vrot.lane.b32.xlu0 %v1596_v34, %s1299_s25 }
  0xef   : > { %v436_v56 = vadd.f32 %v420_v43, %v400_v52  ;;  %v536_v52 = vmul.f32 0.70131, %v1554_v22 }
  0xf0   : > { %723 = vrot.lane.b32.xlu1 %v1600_v35, %s1299_s25  ;;  %v390_v44 = vpop.permute.xlu0 %389 }
  0xf1   : > { %v403_v15 = vadd.f32 %v390_v44, %v1609_v37  ;;  %v537_v44 = vmul.f32 0.70131, %v1543_v19 }
  0xf2   : > { %v424_v45 = vpop.permute.xlu1 %423  ;;  %717 = vrot.lane.b32.xlu0 %v1604_v36, %s1299_s25 }
  0xf3   : > { %v438_v62 = vadd.f32 %v424_v45, %v402_v57 }
  0xf4   : > { %945 = vrot.lane.b32.xlu1 %v1532_v1, %s1297_s16  ;;  %v418_v46 = vpop.permute.xlu0 %417 }
  0xf6   : > { %v428_v47 = vpop.permute.xlu1 %427  ;;  %721 = vrot.lane.b32.xlu0 %v1609_v37, %s1299_s25 }
  0xf8   : > { %949 = vrot.lane.b32.xlu1 %v1510_v26, %s1297_s16  ;;  %v422_v48 = vpop.permute.xlu0 %421 }
  0xf9   : > { %v437_v10 = vadd.f32 %v422_v48, %v401_v6 }
  0xfa   : > { %v444_v49 = vpop.permute.xlu1 %443  ;;  %943 = vrot.lane.b32.xlu0 %v1491_v58, %s1297_s16  ;;  %v404_v58 = vadd.f32 %v392_v41, %v1600_v35  ;;  %v532_v41 = vmul.f32 0.70131, %v1486_v53 }
  0xfb   : > { %v460_v59 = vadd.f32 %v444_v49, %v436_v56  ;;  %v1726_v49 = vmul.f32 0.29869002, %v1486_v53 }
  0xfc   : > { %v426_v50 = vpop.permute.xlu0 %425  ;;  %v440_v4 = vadd.f32 %v428_v47, %v404_v58 }
  0xfd   : > { %v439_v21 = vadd.f32 %v426_v50, %v403_v15 }
  0xfe   : > { %v448_v51 = vpop.permute.xlu1 %447  ;;  %947 = vrot.lane.b32.xlu0 %v1470_v27, %s1297_s16  ;;  %v435_v27 = vadd.f32 %v418_v46, %v399_v0  ;;  %v1720_v46 = vmul.f32 0.29869002, %v1505_v18 }
  0xff   : > { %v462_v1 = vadd.f32 %v448_v51, %v438_v62  ;;  %v1731_v51 = vmul.f32 0.29869002, %v1543_v19 }
 0x100   : > { %v442_v54 = vpop.permute.xlu0 %441 }
 0x101   : > { %v459_v7 = vadd.f32 %v442_v54, %v435_v27 }
 0x102   : > { %v452_v55 = vpop.permute.xlu1 %451 }
 0x103   : > { %v464_v8 = vadd.f32 %v452_v55, %v440_v4 }
 0x104   : > { %v446_v60 = vpop.permute.xlu0 %445 }
 0x105   : > { %v461_v16 = vadd.f32 %v446_v60, %v437_v10 }
 0x106   : > { %v474_v26 = vpop.permute.xlu1 %473 }
 0x107   : > { %v490_v63 = vadd.f32 %v474_v26, %v460_v59  ;;  %v1748_v59 = vmul.f32 0.29869002, %v1554_v22 }
 0x108   : > { %v450_v2 = vpop.permute.xlu0 %449 }
 0x109   : > { %503 = vrot.lane.b32.xlu1 %v490_v63, %s1301_s28  ;;  %v463_v31 = vadd.f32 %v450_v2, %v439_v21 }
 0x10a   : > { %v478_v3 = vpop.permute.xlu1 %477 }
 0x10b   : > { %v492_v5 = vadd.f32 %v478_v3, %v462_v1 }
 0x10c   : > { %v472_v9 = vpop.permute.xlu0 %471 }
 0x10d   : > { %507 = vrot.lane.b32.xlu1 %v492_v5, %s1301_s28  ;;  %v489_v11 = vadd.f32 %v472_v9, %v459_v7 }
 0x10e   : > { %v482_v12 = vpop.permute.xlu1 %481 }
 0x10f   : > { %v494_v13 = vadd.f32 %v482_v12, %v464_v8  ;;  %501 = vrot.lane.b32.xlu0 %v489_v11, %s1301_s28 }
 0x110   : > { %v476_v17 = vpop.permute.xlu0 %475 }
 0x111   : > { %511 = vrot.lane.b32.xlu1 %v494_v13, %s1301_s28  ;;  %v491_v24 = vadd.f32 %v476_v17, %v461_v16 }
 0x112   : > { %v553_v28 = vpop.permute.xlu1 %552 }
 0x113   : > { %v569_v29 = vadd.f32 %v553_v28, %v533_v14  ;;  %505 = vrot.lane.b32.xlu0 %v491_v24, %s1301_s28 }
 0x114   : > { %v480_v38 = vpop.permute.xlu0 %479 }
 0x115   : > { %953 = vrot.lane.b32.xlu1 %v1547_v20, %s1297_s16  ;;  %v493_v40 = vadd.f32 %v480_v38, %v463_v31 }
 0x116   : > { %v557_v42 = vpop.permute.xlu1 %556 }
 0x117   : > { %v571_v43 = vadd.f32 %v557_v42, %v535_v30  ;;  %509 = vrot.lane.b32.xlu0 %v493_v40, %s1301_s28 }
 0x118   : > { %v551_v45 = vpop.permute.xlu0 %550 }
 0x119   : > { %866 = vrot.lane.b32.xlu1 %v1712_v39, %s1299_s25  ;;  %v568_v20 = vadd.f32 %v551_v45, %v532_v41 }
 0x11a   : > { %v561_v47 = vpop.permute.xlu1 %560 }
 0x11b   : > { %v573_v48 = vadd.f32 %v561_v47, %v537_v44  ;;  %951 = vrot.lane.b32.xlu0 %v1562_v25, %s1297_s16  ;;  %v1739_v25 = vmul.f32 0.29869002, %v1465_v23 }
 0x11c   : > { %v555_v50 = vpop.permute.xlu0 %554 }
 0x11d   : > { %870 = vrot.lane.b32.xlu1 %v1720_v46, %s1299_s25  ;;  %v570_v18 = vadd.f32 %v555_v50, %v534_v61 }
 0x11e   : > { %v589_v54 = vpop.permute.xlu1 %588 }
 0x11f   : > { %v1734_v55 = vadd.f32 %v589_v54, %v569_v29  ;;  %864 = vrot.lane.b32.xlu0 %v1726_v49, %s1299_s25 }
 0x120   : > { %v559_v53 = vpop.permute.xlu0 %558 }
 0x121   : > { %874 = vrot.lane.b32.xlu1 %v1731_v51, %s1299_s25  ;;  %v572_v56 = vadd.f32 %v559_v53, %v536_v52 }
 0x122   : > { %v593_v57 = vpop.permute.xlu1 %592 }
 0x123   : > { %v1743_v19 = vadd.f32 %v593_v57, %v571_v43  ;;  %868 = vrot.lane.b32.xlu0 %v1739_v25, %s1299_s25 }
 0x124   : > { %v587_v60 = vpop.permute.xlu0 %586 }
 0x125   : > { %981 = vrot.lane.b32.xlu1 %v533_v14, %s1298_s24  ;;  %v1751_v26 = vadd.f32 %v587_v60, %v568_v20 }
 0x126   : > { %v597_v23 = vpop.permute.xlu1 %596 }
 0x127   : > { %v1753_v62 = vadd.f32 %v597_v23, %v573_v48  ;;  %872 = vrot.lane.b32.xlu0 %v1748_v59, %s1299_s25 }
 0x128   : > { %v591_v63 = vpop.permute.xlu0 %590 }
 0x129   : > { %985 = vrot.lane.b32.xlu1 %v535_v30, %s1298_s24  ;;  %v1758_v0 = vadd.f32 %v591_v63, %v570_v18 }
 0x12a   : > { %v644_v58 = vpop.permute.xlu1 %643 }
 0x12b   : > { %979 = vrot.lane.b32.xlu0 %v532_v41, %s1298_s24  ;;  %v660_v30 = vadd.f32 %v1712_v39, %v644_v58 }
 0x12c   : > { %v595_v22 = vpop.permute.xlu0 %594 }
 0x12d   : > { %989 = vrot.lane.b32.xlu1 %v537_v44, %s1298_s24  ;;  %v1762_v1 = vadd.f32 %v595_v22, %v572_v56 }
 0x12e   : > { %v648_v2 = vpop.permute.xlu1 %647 }
 0x12f   : > { %983 = vrot.lane.b32.xlu0 %v534_v61, %s1298_s24  ;;  %v662_v41 = vadd.f32 %v1720_v46, %v648_v2 }
 0x130   : > { %v642_v27 = vpop.permute.xlu0 %641 }
 0x131   : > { %v659_v45 = vadd.f32 %v1726_v49, %v642_v27 }
 0x132   : > { %v652_v3 = vpop.permute.xlu1 %651 }
 0x133   : > { %987 = vrot.lane.b32.xlu0 %v536_v52, %s1298_s24  ;;  %v664_v61 = vadd.f32 %v1731_v51, %v652_v3 }
 0x134   : > { %v646_v4 = vpop.permute.xlu0 %645 }
 0x135   : > { %v661_v18 = vadd.f32 %v1739_v25, %v646_v4 }
 0x136   : > { %v1766_v5 = vpop.permute.xlu1 %794 }
 0x138   : > { %v650_v6 = vpop.permute.xlu0 %649 }
 0x139   : > { %v663_v49 = vadd.f32 %v1748_v59, %v650_v6 }
 0x13a   : > { %v1768_v7 = vpop.permute.xlu1 %798 }
 0x13c   : > { %v1770_v8 = vpop.permute.xlu0 %792 }
 0x13e   : > { %v1772_v9 = vpop.permute.xlu1 %802 }
 0x140   : > { %v1774_v10 = vpop.permute.xlu0 %796 }
 0x142   : > { %v680_v11 = vpop.permute.xlu1 %679 }
 0x143   : > { %v696_v31 = vadd.f32 %v680_v11, %v660_v30 }
 0x144   : > { %v1776_v12 = vpop.permute.xlu0 %800 }
 0x146   : > { %v684_v13 = vpop.permute.xlu1 %683 }
 0x147   : > { %v698_v43 = vadd.f32 %v684_v13, %v662_v41  ;;  %v813_v13 = vadd.f32 %v1768_v7, %v1591_v33 }
 0x148   : > { %v678_v14 = vpop.permute.xlu0 %677 }
 0x149   : > { %v695_v48 = vadd.f32 %v678_v14, %v659_v45 }
 0x14a   : > { %v688_v15 = vpop.permute.xlu1 %687 }
 0x14b   : > { %v700_v39 = vadd.f32 %v688_v15, %v664_v61 }
 0x14c   : > { %v682_v16 = vpop.permute.xlu0 %681 }
 0x14d   : > { %v697_v53 = vadd.f32 %v682_v16, %v661_v18  ;;  %v815_v16 = vadd.f32 %v1772_v9, %v1600_v35 }
 0x14e   : > { %v831_v17 = vpop.permute.xlu1 %830 }
 0x150   : > { %v686_v21 = vpop.permute.xlu0 %685 }
 0x151   : > { %v699_v60 = vadd.f32 %v686_v21, %v663_v49 }
 0x152   : > { %v1778_v24 = vpop.permute.xlu1 %834 }
 0x153   : > { %v849_v14 = vadd.f32 %v1778_v24, %v813_v13 }
 0x154   : > { %v1780_v28 = vpop.permute.xlu0 %828 }
 0x156   : > { %v1782_v29 = vpop.permute.xlu1 %838 }
 0x157   : > { %v851_v7 = vadd.f32 %v1782_v29, %v815_v16 }
 0x158   : > { %v1785_v38 = vpop.permute.xlu0 %832 }
 0x15a   : > { %v716_v40 = vpop.permute.xlu1 %715 }
 0x15b   : > { %v732_v42 = vadd.f32 %v716_v40, %v696_v31 }
 0x15c   : > { %v1788_v44 = vpop.permute.xlu0 %836 }
 0x15d   : > { %745 = vrot.lane.b32.xlu1 %v732_v42, %s1302_s30 }
 0x15e   : > { %v720_v20 = vpop.permute.xlu1 %719 }
 0x15f   : > { %v734_v47 = vadd.f32 %v720_v20, %v698_v43 }
 0x160   : > { %v714_v50 = vpop.permute.xlu0 %713 }
 0x161   : > { %749 = vrot.lane.b32.xlu1 %v734_v47, %s1302_s30  ;;  %v731_v52 = vadd.f32 %v714_v50, %v695_v48 }
 0x162   : > { %v724_v46 = vpop.permute.xlu1 %723 }
 0x163   : > { %v736_v54 = vadd.f32 %v724_v46, %v700_v39  ;;  %743 = vrot.lane.b32.xlu0 %v731_v52, %s1302_s30 }
 0x164   : > { %v718_v56 = vpop.permute.xlu0 %717 }
 0x165   : > { %753 = vrot.lane.b32.xlu1 %v736_v54, %s1302_s30  ;;  %v733_v57 = vadd.f32 %v718_v56, %v697_v53 }
 0x166   : > { %v946_v63 = vpop.permute.xlu1 %945 }
 0x167   : > { %747 = vrot.lane.b32.xlu0 %v733_v57, %s1302_s30  ;;  %v962_v9 = vadd.f32 %v946_v63, %v1585_v32 }
 0x168   : > { %v722_v51 = vpop.permute.xlu0 %721 }
 0x169   : > { %v735_v23 = vadd.f32 %v722_v51, %v699_v60 }
 0x16a   : > { %v950_v58 = vpop.permute.xlu1 %949 }
 0x16b   : > { %751 = vrot.lane.b32.xlu0 %v735_v23, %s1302_s30  ;;  %v964_v45 = vadd.f32 %v950_v58, %v1591_v33 }
 0x16c   : > { %v944_v22 = vpop.permute.xlu0 %943 }
 0x16d   : > { %v961_v47 = vadd.f32 %v944_v22, %v1596_v34 }
 0x170   : > { %v1794_v2 = vpop.permute.xlu0 %947 }
 0x171   : > { %v963_v50 = vadd.f32 %v1794_v2, %v1604_v36 }
 0x17b   : > { %v504_v25 = vpop.permute.xlu1 %503 }
 0x17c   : > { %521 = vst.msk [vmem:[%s1798_s2 + $0x8] sm:$0xff] %vm519_vm3, %v504_v25 }
 0x17d   : > { %612 = vst.msk [vmem:[%s1798_s2 + $0x8] sm:$0xff] %vm610_vm4, %v1734_v55 }
 0x17f   : > { %v508_v59 = vpop.permute.xlu1 %507 }
 0x180   : > { %523 = vst.msk [vmem:[%s1798_s2 + $0x18] sm:$0xff] %vm519_vm3, %v508_v59 }
 0x181   : > { %614 = vst.msk [vmem:[%s1798_s2 + $0x18] sm:$0xff] %vm610_vm4, %v1743_v19  ;;  %v502_v27 = vpop.permute.xlu0 %501  ;;  %v811_v19 = vadd.f32 %v1766_v5, %v1585_v32 }
 0x182   : > { %520 = vst.msk [vmem:[%s1798_s2] sm:$0xff] %vm519_vm3, %v502_v27 }
 0x183   : > { %v512_v3 = vpop.permute.xlu1 %511  ;;  %611 = vst.msk [vmem:[%s1798_s2] sm:$0xff] %vm610_vm4, %v1751_v26  ;;  %v847_v6 = vadd.f32 %v831_v17, %v811_v19 }
 0x184   : > { %525 = vst.msk [vmem:[%s1798_s2 + $0x28] sm:$0xff] %vm519_vm3, %v512_v3 }
 0x185   : > { %616 = vst.msk [vmem:[%s1798_s2 + $0x28] sm:$0xff] %vm610_vm4, %v1753_v62  ;;  %v506_v55 = vpop.permute.xlu0 %505 }
 0x186   : > { %522 = vst.msk [vmem:[%s1798_s2 + $0x10] sm:$0xff] %vm519_vm3, %v506_v55 }
 0x187   : > { %v954_v4 = vpop.permute.xlu1 %953  ;;  %613 = vst.msk [vmem:[%s1798_s2 + $0x10] sm:$0xff] %vm610_vm4, %v1758_v0  ;;  %v810_v0 = vadd.f32 %v1770_v8, %v1596_v34 }
 0x189   : > { %v510_v11 = vpop.permute.xlu0 %509  ;;  %v846_v21 = vadd.f32 %v1780_v28, %v810_v0  ;;  %v814_v28 = vadd.f32 %v1776_v12, %v1609_v37  ;;  %v966_v12 = vadd.f32 %v954_v4, %v1600_v35 }
 0x18a   : > { %524 = vst.msk [vmem:[%s1798_s2 + $0x20] sm:$0xff] %vm519_vm3, %v510_v11 }
 0x18b   : > { %v867_v26 = vpop.permute.xlu1 %866  ;;  %615 = vst.msk [vmem:[%s1798_s2 + $0x20] sm:$0xff] %vm610_vm4, %v1762_v1  ;;  %v812_v1 = vadd.f32 %v1774_v10, %v1604_v36  ;;  %v850_v10 = vadd.f32 %v1788_v44, %v814_v28 }
 0x18c   : > { %v883_v62 = vadd.f32 %v867_v26, %v847_v6 }
 0x18d   : > { %v952_v15 = vpop.permute.xlu0 %951  ;;  %v848_v8 = vadd.f32 %v1785_v38, %v812_v1 }
 0x18e   : > { %896 = vrot.lane.b32.xlu1 %v883_v62, %s1301_s28  ;;  %v965_v35 = vadd.f32 %v952_v15, %v1609_v37 }
 0x18f   : > { %v871_v5 = vpop.permute.xlu1 %870 }
 0x190   : > { %v885_v17 = vadd.f32 %v871_v5, %v849_v14 }
 0x191   : > { %v865_v30 = vpop.permute.xlu0 %864 }
 0x192   : > { %900 = vrot.lane.b32.xlu1 %v885_v17, %s1301_s28  ;;  %v882_v24 = vadd.f32 %v865_v30, %v846_v21 }
 0x193   : > { %v875_v31 = vpop.permute.xlu1 %874 }
 0x194   : > { %v887_v40 = vadd.f32 %v875_v31, %v851_v7  ;;  %894 = vrot.lane.b32.xlu0 %v882_v24, %s1301_s28 }
 0x195   : > { %v869_v41 = vpop.permute.xlu0 %868 }
 0x196   : > { %904 = vrot.lane.b32.xlu1 %v887_v40, %s1301_s28  ;;  %v884_v29 = vadd.f32 %v869_v41, %v848_v8 }
 0x197   : > { %v982_v42 = vpop.permute.xlu1 %981 }
 0x198   : > { %v998_v43 = vadd.f32 %v982_v42, %v962_v9  ;;  %898 = vrot.lane.b32.xlu0 %v884_v29, %s1301_s28 }
 0x199   : > { %v873_v38 = vpop.permute.xlu0 %872 }
 0x19a   : > { %1011 = vrot.lane.b32.xlu1 %v998_v43, %s1301_s28  ;;  %v886_v20 = vadd.f32 %v873_v38, %v850_v10 }
 0x19b   : > { %v986_v32 = vpop.permute.xlu1 %985 }
 0x19c   : > { %v1000_v61 = vadd.f32 %v986_v32, %v964_v45  ;;  %902 = vrot.lane.b32.xlu0 %v886_v20, %s1301_s28 }
 0x19d   : > { %v980_v48 = vpop.permute.xlu0 %979 }
 0x19e   : > { %1015 = vrot.lane.b32.xlu1 %v1000_v61, %s1301_s28  ;;  %v997_v44 = vadd.f32 %v980_v48, %v961_v47 }
 0x19f   : > { %v990_v39 = vpop.permute.xlu1 %989 }
 0x1a0   : > { %v1002_v33 = vadd.f32 %v990_v39, %v966_v12  ;;  %1009 = vrot.lane.b32.xlu0 %v997_v44, %s1301_s28 }
 0x1a1   : > { %v984_v18 = vpop.permute.xlu0 %983 }
 0x1a2   : > { %1019 = vrot.lane.b32.xlu1 %v1002_v33, %s1301_s28  ;;  %v999_v34 = vadd.f32 %v984_v18, %v963_v50 }
 0x1a4   : > { %1013 = vrot.lane.b32.xlu0 %v999_v34, %s1301_s28 }
 0x1a5   : > { %v988_v52 = vpop.permute.xlu0 %987 }
 0x1a6   : > { %v1001_v46 = vadd.f32 %v988_v52, %v965_v35 }
 0x1a8   : > { %1017 = vrot.lane.b32.xlu0 %v1001_v46, %s1301_s28 }
 0x1cf   : > { %v746_v36 = vpop.permute.xlu1 %745 }
 0x1d0   : > { %763 = vst.msk [vmem:[%s1798_s2 + $0x8] sm:$0xff] %vm761_vm5, %v746_v36 }
 0x1d3   : > { %v750_v54 = vpop.permute.xlu1 %749 }
 0x1d4   : > { %765 = vst.msk [vmem:[%s1798_s2 + $0x18] sm:$0xff] %vm761_vm5, %v750_v54 }
 0x1d5   : > { %v744_v53 = vpop.permute.xlu0 %743 }
 0x1d6   : > { %762 = vst.msk [vmem:[%s1798_s2] sm:$0xff] %vm761_vm5, %v744_v53 }
 0x1d7   : > { %v754_v56 = vpop.permute.xlu1 %753 }
 0x1d8   : > { %767 = vst.msk [vmem:[%s1798_s2 + $0x28] sm:$0xff] %vm761_vm5, %v754_v56 }
 0x1d9   : > { %v748_v37 = vpop.permute.xlu0 %747 }
 0x1da   : > { %764 = vst.msk [vmem:[%s1798_s2 + $0x10] sm:$0xff] %vm761_vm5, %v748_v37 }
 0x1dd   : > { %v752_v49 = vpop.permute.xlu0 %751 }
 0x1de   : > { %766 = vst.msk [vmem:[%s1798_s2 + $0x20] sm:$0xff] %vm761_vm5, %v752_v49 }
 0x200   : > { %v897_v57 = vpop.permute.xlu1 %896 }
 0x201   : > { %914 = vst.msk [vmem:[%s1798_s2 + $0x8] sm:$0xff] %vm912_vm6, %v897_v57 }
 0x204   : > { %v901_v60 = vpop.permute.xlu1 %900 }
 0x205   : > { %916 = vst.msk [vmem:[%s1798_s2 + $0x18] sm:$0xff] %vm912_vm6, %v901_v60 }
 0x206   : > { %v895_v51 = vpop.permute.xlu0 %894 }
 0x207   : > { %913 = vst.msk [vmem:[%s1798_s2] sm:$0xff] %vm912_vm6, %v895_v51 }
 0x208   : > { %v905_v23 = vpop.permute.xlu1 %904 }
 0x209   : > { %918 = vst.msk [vmem:[%s1798_s2 + $0x28] sm:$0xff] %vm912_vm6, %v905_v23 }
 0x20a   : > { %v899_v63 = vpop.permute.xlu0 %898 }
 0x20b   : > { %915 = vst.msk [vmem:[%s1798_s2 + $0x10] sm:$0xff] %vm912_vm6, %v899_v63 }
 0x20c   : > { %v1012_v58 = vpop.permute.xlu1 %1011 }
 0x20d   : > { %1029 = vst.msk [vmem:[%s1798_s2 + $0x8] sm:$0xff] %vm1027_vm7, %v1012_v58 }
 0x20e   : > { %v903_v22 = vpop.permute.xlu0 %902 }
 0x20f   : > { %917 = vst.msk [vmem:[%s1798_s2 + $0x20] sm:$0xff] %vm912_vm6, %v903_v22 }
 0x210   : > { %v1016_v25 = vpop.permute.xlu1 %1015 }
 0x211   : > { %1031 = vst.msk [vmem:[%s1798_s2 + $0x18] sm:$0xff] %vm1027_vm7, %v1016_v25 }
 0x212   : > { %v1010_v2 = vpop.permute.xlu0 %1009 }
 0x213   : > { %1028 = vst.msk [vmem:[%s1798_s2] sm:$0xff] %vm1027_vm7, %v1010_v2 }
 0x214   : > { %v1020_v59 = vpop.permute.xlu1 %1019 }
 0x215   : > { %1033 = vst.msk [vmem:[%s1798_s2 + $0x28] sm:$0xff] %vm1027_vm7, %v1020_v59 }
 0x216   : > { %v1014_v27 = vpop.permute.xlu0 %1013 }
 0x217   : > { %1030 = vst.msk [vmem:[%s1798_s2 + $0x10] sm:$0xff] %vm1027_vm7, %v1014_v27 }
 0x21a   : > { %v1018_v3 = vpop.permute.xlu0 %1017 }
 0x21b   : > { %1032 = vst.msk [vmem:[%s1798_s2 + $0x20] sm:$0xff] %vm1027_vm7, %v1018_v3 }
 0x21c   : > { %1239 = shalt.err (!%p1236_p2)
}
 0x21d   : > { %s1240_s23 = scalar_lea.hbm %s1893_s13, 768  ;;  %s1244_s16 = scalar_lea.hbm %s1942_s1, 1536 }
 0x21e   : > { %p1241_p4 = scmp.ne.s32.totalorder %s1893_s13, %s1240_s23  ;;  %p1245_p9 = scmp.lt.u32.totalorder %s1893_s13, %s1942_s1 }
 0x21f   : > { %p1246_p1 = scmp.lt.u32.totalorder %s1244_s16, %s1240_s23  ;;  %p1248_p6 = scmp.lt.u32.totalorder %s1240_s23, %s1893_s13 }
 0x220   : > { %p1242_p5 = pnand %p1241_p4, %p1948_p11 }
 0x221   : > { %p1247_p3 = por %p1246_p1, %p1245_p9 }
 0x222   : > { %p1243_p7 = pneg %p1242_p5 }
 0x223   : > { %p1249_p12 = por %p1248_p6, %p1247_p3 }
 0x225   : > { %p1250_p13 = pnand %p1249_p12, %p1243_p7 }
 0x227   : > { %1253 = shalt.err (!%p1250_p13)
}
 0x228   : > { %s1304_s27 = smov 128   ;;  %s1305_s28 = smov 8  }
 0x229   : > { %1142 = dma.vmem_to_hbm [thread:$0]  (%p1948_p11), %s1895_s4, 768, %s1893_s13, %s1035_s14, %s1304_s27, %s1304_s27, %s1305_s28  }
 0x22a PF: > { %s1064_s30 = sand.u32 1, %s1280_s6   ;;  %p1949_p8 = scmp.ne.s32.totalorder %s1946_s18, 0 }
 0x22b   : > { %p1950_p10 = scmp.ge.s32.totalorder %s1292_s9, 2  ;;  %s1065_s2 = scalar_lea.sflag [#allocation5], %s1064_s30 }
 0x22d   : > { %p1149_p0 = pnand %p1950_p10, %p1949_p8 }
 0x22f   : > { %1275 = dma.done.wait (!%p1149_p0), %s1065_s2, 768  }
 0x230   : > { %1277 = vsyncadd (!%p1149_p0), %s1065_s2, 4294966528  ;;  %p14_p2 = scmp.ge.s32.totalorder %s1341_s12, 4   ;;  %s1951_s6 = smov %s1284_s7 }
 0x231   : > { %s1952_s7 = smov %s1288_s8  ;;  %s1953_s8 = smov %s1353_s15 }
 0x232   : > { %s1954_s9 = smov %s1341_s12  ;;  %16 = sbr.rel (!%p14_p2) target bundleno = 5 (0x5), region = 69 }
 0x239   :  { %1070 = vsyncpa [#allocation4], 1 }
 0x23a   :  { %1072 = vsyncpa [#allocation4 + $0x1], 1 }
 0x23b   :  { %1073 = vsyncpa [#allocation5], 1 }
 0x23c   :  { %1075 = vsyncpa [#allocation5 + $0x1], 1 }

</bundles_post_ra>
